<compile_context>
chip_gen: v7x
topology: tpu7x:2x2x1
jax: 0.10.0
libtpu: 0.0.40
codegen_flags: <defaults>
</compile_context>

<pallas_src>
import functools
import math

import jax
import jax.numpy as jnp
from jax.experimental import pallas as pl
from jax.experimental.pallas import tpu as pltpu


_EPS = 1e-5
_VMEM_LIMIT_BYTES = 48 * 1024 * 1024    # scoped-VMEM cap; safe on v5e/v6e (128 MiB) and v7x (64 MiB)
_BLOCK_BUDGET_BYTES = 24 * 1024 * 1024  # per-step working set incl. double buffers + temporaries


def _layernorm(x, w, b, eps=_EPS):
    mu = jnp.mean(x, axis=-1, keepdims=True)
    var = jnp.mean((x - mu) ** 2, axis=-1, keepdims=True)
    return (x - mu) * jax.lax.rsqrt(var + eps) * w + b


# -----------------------------------------------------------------------------
# Kernels
# -----------------------------------------------------------------------------
def _row_tied_kernel(x_ref, vec_ref, bg_ref, wv_ref, wg_ref, wo_ref, o_ref,
                     *, eps=_EPS):
    """Row (tied) attention, pre/post-LN fused.  context = sum_j V[j] per row."""
    TB, N, D = x_ref.shape
    inner = wv_ref.shape[1]

    vecs = vec_ref[...]                                   # (5, D): prew, preb, lnw, lnb, bo
    prew, preb, lnw, lnb, bo = (vecs[i:i + 1, :] for i in range(5))

    x2 = _layernorm(x_ref[...].reshape(TB * N, D), prew, preb, eps)   # pre-LN (f32)
    xb = x2.astype(jnp.bfloat16)

    # sum over the sequence commutes with the linear V projection (TB rows, not TB*N)
    xsum = jnp.sum(x2.reshape(TB, N, D), axis=1).astype(jnp.bfloat16)          # (TB, D)
    vctx = jnp.dot(xsum, wv_ref[...], preferred_element_type=jnp.float32)      # (TB, inner)

    gates = jnp.dot(xb, wg_ref[...], preferred_element_type=jnp.float32) + bg_ref[...]
    gated = jax.nn.sigmoid(gates).reshape(TB, N, inner) * vctx.reshape(TB, 1, inner)

    out = jnp.dot(gated.reshape(TB * N, inner).astype(jnp.bfloat16), wo_ref[...],
                  preferred_element_type=jnp.float32) + bo
    out = _layernorm(x2 + out, lnw, lnb, eps)             # residual (vs pre-LN'd x) + post-LN
    o_ref[...] = out.reshape(TB, N, D)


def _col_kernel(x_ref, vec_ref, bg_ref, wqkvg_ref, wo_ref, o_ref,
                *, heads, dim_head, eps=_EPS):
    """Column (untied) softmax(QK^T)V attention over the H axis, in-VMEM axis swap."""
    _, H, TBW, D = x_ref.shape
    inner = heads * dim_head
    R = TBW * H

    vecs = vec_ref[...]
    prew, preb, lnw, lnb, bo = (vecs[i:i + 1, :] for i in range(5))

    x = x_ref[...].reshape(H, TBW, D)
    xw = jnp.transpose(x, (1, 0, 2))                      # (TBW, H, D) — single in-VMEM relayout
    x2 = _layernorm(xw.reshape(R, D), prew, preb, eps)    # pre-LN (f32)
    xb = x2.astype(jnp.bfloat16)

    # one wide matmul: [Wq*scale | Wk | Wv | Wg]
    proj = jnp.dot(xb, wqkvg_ref[...], preferred_element_type=jnp.float32)     # (R, 4*inner)
    qkv = proj[:, :3 * inner].astype(jnp.bfloat16).reshape(TBW, H, 3 * inner)
    gates = proj[:, 3 * inner:] + bg_ref[...]

    ctx_heads = []
    for h in range(heads):                                # static unroll, lane slices only
        qh = qkv[:, :, h * dim_head:(h + 1) * dim_head]
        kh = qkv[:, :, inner + h * dim_head:inner + (h + 1) * dim_head]
        vh = qkv[:, :, 2 * inner + h * dim_head:2 * inner + (h + 1) * dim_head]
        s = jnp.einsum('bqd,bkd->bqk', qh, kh, preferred_element_type=jnp.float32)
        s = s - jnp.max(s, axis=-1, keepdims=True)
        p = jnp.exp(s)
        ctx = jnp.einsum('bqk,bkd->bqd', p.astype(jnp.bfloat16), vh,
                         preferred_element_type=jnp.float32)
        # normalise the (q, dim_head) context, not the (q, k) score matrix
        ctx_heads.append(ctx * pl.reciprocal(jnp.sum(p, axis=-1, keepdims=True),
                                             approx=True))
    ctx = jnp.concatenate(ctx_heads, axis=-1).reshape(R, inner)

    out = ctx * jax.nn.sigmoid(gates)
    out = jnp.dot(out.astype(jnp.bfloat16), wo_ref[...],
                  preferred_element_type=jnp.float32) + bo
    out = _layernorm(x2 + out, lnw, lnb, eps)             # residual + post-LN
    out = jnp.transpose(out.reshape(TBW, H, D), (1, 0, 2))
    o_ref[...] = out.reshape(1, H, TBW, D)


# -----------------------------------------------------------------------------
# Block-size selection (accounts for double buffering + temporaries)
# -----------------------------------------------------------------------------
def _choose_row_block(Bf, N, D, inner):
    def est(tb):
        rows = tb * N
        # x/out blocks double-buffered + f32/bf16 temporaries + weights
        return rows * (32 * D + 16 * inner) + 16 * D * inner

    divisors = [t for t in range(1, Bf + 1) if Bf % t == 0]
    fitting = [t for t in divisors if est(t) <= _BLOCK_BUDGET_BYTES] or [1]
    even = [t for t in fitting if (Bf // t) % 2 == 0]     # keep both v7x cores busy
    return max(even or fitting)                            # biggest block that fits


def _choose_col_block(B, H, W, D, inner):
    def est(tbw):
        rows = tbw * H
        # blocks (dbl-buffered) + transposes + proj/q/k/v/ctx + per-head scores + weights
        return rows * (40 * D + 40 * inner + 16 * H) + 24 * D * inner

    cands = [t for t in range(1, W + 1) if W % t == 0 and (t % 8 == 0 or t == W)]
    fitting = [t for t in cands if est(t) <= _BLOCK_BUDGET_BYTES] or [min(cands)]
    even = [t for t in fitting if (B * (W // t)) % 2 == 0]
    return max(even or fitting)


# -----------------------------------------------------------------------------
# pallas_call wrappers
# -----------------------------------------------------------------------------
def _pack_small_params(params, inner):
    vecs = jnp.stack([params['pre_lnw'], params['pre_lnb'],
                      params['lnw'], params['lnb'], params['bo']]).astype(jnp.float32)
    bg = params['bg'].reshape(1, inner).astype(jnp.float32)
    return vecs, bg


def _row_attention_call(xf, params, *, heads, dim_head):
    Bf, N, D = xf.shape
    inner = heads * dim_head
    TB = _choose_row_block(Bf, N, D, inner)
    vecs, bg = _pack_small_params(params, inner)
    wv = params['wkv'][:, inner:].astype(jnp.bfloat16)
    wg = params['wg'].astype(jnp.bfloat16)
    wo = params['wo'].astype(jnp.bfloat16)

    x_spec = pl.BlockSpec((TB, N, D), lambda b: (b, 0, 0))
    const = lambda shape: pl.BlockSpec(shape, lambda b: (0, 0))

    return pl.pallas_call(
        _row_tied_kernel,
        out_shape=jax.ShapeDtypeStruct((Bf, N, D), jnp.float32),
        grid=(Bf // TB,),
        in_specs=[x_spec, const((5, D)), const((1, inner)),
                  const((D, inner)), const((D, inner)), const((inner, D))],
        out_specs=x_spec,
        compiler_params=pltpu.CompilerParams(
            dimension_semantics=("parallel",),
            vmem_limit_bytes=_VMEM_LIMIT_BYTES),
    )(xf, vecs, bg, wv, wg, wo)


def _col_attention_call(x, params, *, heads, dim_head):
    B, H, W, D = x.shape
    inner = heads * dim_head
    scale = dim_head ** -0.5
    TBW = _choose_col_block(B, H, W, D, inner)
    vecs, bg = _pack_small_params(params, inner)
    wqkvg = jnp.concatenate([params['wq'] * scale,          # fold the 1/sqrt(dh) scale into Wq
                             params['wkv'][:, :inner],
                             params['wkv'][:, inner:],
                             params['wg']], axis=1).astype(jnp.bfloat16)
    wo = params['wo'].astype(jnp.bfloat16)

    x_spec = pl.BlockSpec((1, H, TBW, D), lambda b, w: (b, 0, w, 0))
    const = lambda shape: pl.BlockSpec(shape, lambda b, w: (0, 0))

    kernel = functools.partial(_col_kernel, heads=heads, dim_head=dim_head)
    return pl.pallas_call(
        kernel,
        out_shape=jax.ShapeDtypeStruct((B, H, W, D), jnp.float32),
        grid=(B, W // TBW),
        in_specs=[x_spec, const((5, D)), const((1, inner)),
                  const((D, 4 * inner)), const((inner, D))],
        out_specs=x_spec,
        compiler_params=pltpu.CompilerParams(
            dimension_semantics=("parallel", "parallel"),
            vmem_limit_bytes=_VMEM_LIMIT_BYTES),
    )(x, vecs, bg, wqkvg, wo)


# -----------------------------------------------------------------------------
# AxialAttention.forward
# -----------------------------------------------------------------------------
@functools.partial(jax.jit, static_argnames=("heads", "dim_head", "row_attn"))
def axial_attention_forward(x, params, *, heads, dim_head=64, row_attn=True):
    """AxialAttention.forward (row_attn XOR col_attn).  x: [B, H, W, D]."""
    B, H, W, D = x.shape
    if row_attn:                        # 'b h w d -> (b h) w d' is a free reshape; tied
        out = _row_attention_call(x.reshape(B * H, W, D), params,
                                  heads=heads, dim_head=dim_head)
        return out.reshape(B, H, W, D)
    # column attention over H; the (b w) fold is done inside the kernel (no HBM transpose)
    return _col_attention_call(x, params, heads=heads, dim_head=dim_head)


# -----------------------------------------------------------------------------
# Pure-JAX f32 reference: literal transcription of the PyTorch forward
# -----------------------------------------------------------------------------
def _reference_forward(x, params, *, heads, dim_head, row_attn, eps=_EPS):
    B, H, W, D = x.shape
    inner = heads * dim_head
    scale = dim_head ** -0.5
    xn = _layernorm(x, params['pre_lnw'], params['pre_lnb'], eps)   # AxialAttention.norm
    if row_attn:
        xf, tied = xn.reshape(B * H, W, D), True
    else:
        xf, tied = jnp.transpose(xn, (0, 2, 1, 3)).reshape(B * W, H, D), False
    n = xf.shape[1]
    q = xf @ params['wq']
    k = xf @ params['wkv'][:, :inner]
    v = xf @ params['wkv'][:, inner:]
    split = lambda t: jnp.transpose(t.reshape(-1, n, heads, dim_head), (0, 2, 1, 3))
    q, k, v = split(q) * scale, split(k), split(v)
    dots = jnp.einsum('bhid,bhjd->bhij', q, k)
    if tied:
        # literal: `dots` is reassigned to the (...,1) row-average before expand_as,
        # so softmax acts on a singleton axis; torch.einsum then broadcasts over j.
        rowwise_average = jnp.mean(dots, axis=3, keepdims=True)
        dots = rowwise_average / math.sqrt(dots.shape[0])
        dots = jnp.broadcast_to(rowwise_average, dots.shape)
    attn = jax.nn.softmax(dots, axis=-1)
    attn = jnp.broadcast_to(attn, (*attn.shape[:3], n))             # torch-einsum broadcasting
    out = jnp.einsum('bhij,bhjd->bhid', attn, v)
    out = jnp.transpose(out, (0, 2, 1, 3)).reshape(-1, n, inner)
    gates = xf @ params['wg'] + params['bg']
    out = out * jax.nn.sigmoid(gates)
    out = out @ params['wo'] + params['bo']
    out = _layernorm(xf + out, params['lnw'], params['lnb'], eps)   # Attention.norm
    if row_attn:
        return out.reshape(B, H, W, D)
    return jnp.transpose(out.reshape(B, W, H, D), (0, 2, 1, 3))


# -----------------------------------------------------------------------------
# Deterministic parameter initialization (matches PyTorch module defaults)
# -----------------------------------------------------------------------------
def _uniform(key, shape, lim):
    return jax.random.uniform(key, shape, jnp.float32, -lim, lim)


def init_axial_attention_params(key, dim, heads, dim_head=64):
    inner = heads * dim_head
    k = jax.random.split(key, 4)
    lim_d = 1.0 / math.sqrt(dim)
    lim_i = 1.0 / math.sqrt(inner)
    return dict(
        pre_lnw=jnp.ones((dim,), jnp.float32),        # AxialAttention.norm
        pre_lnb=jnp.zeros((dim,), jnp.float32),
        wq=_uniform(k[0], (dim, inner), lim_d),       # to_q (no bias)
        wkv=_uniform(k[1], (dim, 2 * inner), lim_d),  # to_kv (no bias)
        wg=jnp.zeros((dim, inner), jnp.float32),      # gating.weight = 0
        bg=jnp.ones((inner,), jnp.float32),           # gating.bias   = 1
        wo=_uniform(k[2], (inner, dim), lim_i),       # to_out
        bo=_uniform(k[3], (dim,), lim_i),
        lnw=jnp.ones((dim,), jnp.float32),            # Attention.norm
        lnb=jnp.zeros((dim,), jnp.float32),
    )


# -----------------------------------------------------------------------------
if __name__ == "__main__":
    # TODO(synk): dropout is identity (eval mode); `mask`/`edges` are accepted but
    # unused by the reference Attention/AxialAttention and are not implemented.
    B, H, W, D = 2, 8, 16, 32
    heads, dim_head = 2, 64

    key = jax.random.PRNGKey(0)
    k_row, k_col, k_x = jax.random.split(key, 3)
    row_params = init_axial_attention_params(k_row, D, heads, dim_head)
    col_params = init_axial_attention_params(k_col, D, heads, dim_head)
    x = jax.random.normal(k_x, (B, H, W, D), jnp.float32)

    # AxialAttention(row_attn=True) then AxialAttention(col_attn=True):
    # exercises both the tied and the untied kernels.
    y_row = axial_attention_forward(x, row_params, heads=heads, dim_head=dim_head,
                                    row_attn=True)
    y_col = axial_attention_forward(y_row, col_params, heads=heads, dim_head=dim_head,
                                    row_attn=False)
    jax.block_until_ready(y_col)

    assert y_col.shape == (B, H, W, D)
    assert bool(jnp.all(jnp.isfinite(y_col)))

    # tolerance-based check vs the literal f32 reference (bf16 matmuls in-kernel)
    ref_row = _reference_forward(x, row_params, heads=heads, dim_head=dim_head,
                                 row_attn=True)
    ref_col = _reference_forward(y_row, col_params, heads=heads, dim_head=dim_head,
                                 row_attn=False)
    err_row = float(jnp.max(jnp.abs(y_row - ref_row)))
    err_col = float(jnp.max(jnp.abs(y_col - ref_col)))
    assert err_row < 5e-2, f"row-attention max abs error {err_row}"
    assert err_col < 5e-2, f"col-attention max abs error {err_col}"

    print("KERNEL_OK")
</pallas_src>

<mosaic_0001>
module attributes {stable_mosaic.version = 11 : i64} {
  func.func @_row_tied_kernel(%arg0: i32, %arg1: memref<8x16x32xf32, #tpu.memory_space<vmem>>, %arg2: memref<5x32xf32, #tpu.memory_space<vmem>>, %arg3: memref<1x128xf32, #tpu.memory_space<vmem>>, %arg4: memref<32x128xbf16, #tpu.memory_space<vmem>>, %arg5: memref<32x128xbf16, #tpu.memory_space<vmem>>, %arg6: memref<128x32xbf16, #tpu.memory_space<vmem>>, %arg7: memref<8x16x32xf32, #tpu.memory_space<vmem>>) attributes {dimension_semantics = [#tpu.dimension_semantics<parallel>], iteration_bounds = array<i64: 2>, scalar_prefetch = 0 : i64, scratch_operands = 0 : i64, tpu.core_type = #tpu.core_type<tc>, window_params = [{transform_indices = @transform_0, window_bounds = array<i64: 8, 16, 32>}, {pipeline_mode = #tpu.pipeline_mode<synchronous>, transform_indices = @transform_1, window_bounds = array<i64: 5, 32>}, {pipeline_mode = #tpu.pipeline_mode<synchronous>, transform_indices = @transform_2, window_bounds = array<i64: 1, 128>}, {pipeline_mode = #tpu.pipeline_mode<synchronous>, transform_indices = @transform_3, window_bounds = array<i64: 32, 128>}, {pipeline_mode = #tpu.pipeline_mode<synchronous>, transform_indices = @transform_4, window_bounds = array<i64: 32, 128>}, {pipeline_mode = #tpu.pipeline_mode<synchronous>, transform_indices = @transform_5, window_bounds = array<i64: 128, 32>}, {transform_indices = @transform_6, window_bounds = array<i64: 8, 16, 32>}]} {
    %c0 = arith.constant 0 : index
    %c0_0 = arith.constant 0 : index
    %0 = vector.load %arg2[%c0, %c0_0] : memref<5x32xf32, #tpu.memory_space<vmem>>, vector<5x32xf32>
    %1 = vector.extract_strided_slice %0 {offsets = [0, 0], sizes = [1, 32], strides = [1, 1]} : vector<5x32xf32> to vector<1x32xf32>
    %2 = vector.extract_strided_slice %0 {offsets = [1, 0], sizes = [1, 32], strides = [1, 1]} : vector<5x32xf32> to vector<1x32xf32>
    %3 = vector.extract_strided_slice %0 {offsets = [2, 0], sizes = [1, 32], strides = [1, 1]} : vector<5x32xf32> to vector<1x32xf32>
    %4 = vector.extract_strided_slice %0 {offsets = [3, 0], sizes = [1, 32], strides = [1, 1]} : vector<5x32xf32> to vector<1x32xf32>
    %5 = vector.extract_strided_slice %0 {offsets = [4, 0], sizes = [1, 32], strides = [1, 1]} : vector<5x32xf32> to vector<1x32xf32>
    %c0_1 = arith.constant 0 : index
    %c0_2 = arith.constant 0 : index
    %c0_3 = arith.constant 0 : index
    %6 = vector.load %arg1[%c0_1, %c0_2, %c0_3] : memref<8x16x32xf32, #tpu.memory_space<vmem>>, vector<8x16x32xf32>
    %7 = vector.shape_cast %6 : vector<8x16x32xf32> to vector<128x32xf32>
    %cst = arith.constant dense<0.000000e+00> : vector<128xf32>
    %8 = vector.multi_reduction <add>, %7, %cst [1] : vector<128x32xf32> to vector<128xf32>
    %9 = vector.shape_cast %8 : vector<128xf32> to vector<128x1xf32>
    %cst_4 = arith.constant 3.200000e+01 : f32
    %10 = vector.broadcast %cst_4 : f32 to vector<128x1xf32>
    %11 = arith.divf %9, %10 : vector<128x1xf32>
    %12 = vector.broadcast %11 : vector<128x1xf32> to vector<128x32xf32>
    %13 = arith.subf %7, %12 : vector<128x32xf32>
    %14 = arith.mulf %13, %13 : vector<128x32xf32>
    %cst_5 = arith.constant dense<0.000000e+00> : vector<128xf32>
    %15 = vector.multi_reduction <add>, %14, %cst_5 [1] : vector<128x32xf32> to vector<128xf32>
    %16 = vector.shape_cast %15 : vector<128xf32> to vector<128x1xf32>
    %cst_6 = arith.constant 3.200000e+01 : f32
    %17 = vector.broadcast %cst_6 : f32 to vector<128x1xf32>
    %18 = arith.divf %16, %17 : vector<128x1xf32>
    %19 = vector.broadcast %11 : vector<128x1xf32> to vector<128x32xf32>
    %20 = arith.subf %7, %19 : vector<128x32xf32>
    %cst_7 = arith.constant 9.99999974E-6 : f32
    %21 = vector.broadcast %cst_7 : f32 to vector<128x1xf32>
    %22 = arith.addf %18, %21 : vector<128x1xf32>
    %23 = math.rsqrt %22 : vector<128x1xf32>
    %24 = vector.broadcast %23 : vector<128x1xf32> to vector<128x32xf32>
    %25 = arith.mulf %20, %24 : vector<128x32xf32>
    %26 = vector.broadcast %1 : vector<1x32xf32> to vector<128x32xf32>
    %27 = arith.mulf %25, %26 : vector<128x32xf32>
    %28 = vector.broadcast %2 : vector<1x32xf32> to vector<128x32xf32>
    %29 = arith.addf %27, %28 : vector<128x32xf32>
    %30 = arith.truncf %29 : vector<128x32xf32> to vector<128x32xbf16>
    %31 = vector.shape_cast %29 : vector<128x32xf32> to vector<8x16x32xf32>
    %cst_8 = arith.constant dense<0.000000e+00> : vector<8x32xf32>
    %32 = vector.multi_reduction <add>, %31, %cst_8 [1] : vector<8x16x32xf32> to vector<8x32xf32>
    %33 = arith.truncf %32 : vector<8x32xf32> to vector<8x32xbf16>
    %c0_9 = arith.constant 0 : index
    %c0_10 = arith.constant 0 : index
    %34 = vector.load %arg4[%c0_9, %c0_10] : memref<32x128xbf16, #tpu.memory_space<vmem>>, vector<32x128xbf16>
    %cst_11 = arith.constant dense<0.000000e+00> : vector<8x128xf32>
    %35 = tpu.matmul %33, %34, %cst_11 {dimension_numbers = #tpu.dot_dimension_numbers<[1], [0], [0], [1], [0, 0, 1, 1], [], []>} : vector<8x32xbf16>, vector<32x128xbf16>, vector<8x128xf32> -> vector<8x128xf32>
    %c0_12 = arith.constant 0 : index
    %c0_13 = arith.constant 0 : index
    %36 = vector.load %arg5[%c0_12, %c0_13] : memref<32x128xbf16, #tpu.memory_space<vmem>>, vector<32x128xbf16>
    %cst_14 = arith.constant dense<0.000000e+00> : vector<128x128xf32>
    %37 = tpu.matmul %30, %36, %cst_14 {dimension_numbers = #tpu.dot_dimension_numbers<[1], [0], [0], [1], [0, 0, 1, 1], [], []>} : vector<128x32xbf16>, vector<32x128xbf16>, vector<128x128xf32> -> vector<128x128xf32>
    %c0_15 = arith.constant 0 : index
    %c0_16 = arith.constant 0 : index
    %38 = vector.load %arg3[%c0_15, %c0_16] : memref<1x128xf32, #tpu.memory_space<vmem>>, vector<1x128xf32>
    %39 = vector.broadcast %38 : vector<1x128xf32> to vector<128x128xf32>
    %40 = arith.addf %37, %39 : vector<128x128xf32>
    %41 = arith.negf %40 : vector<128x128xf32>
    %42 = math.exp %41 : vector<128x128xf32>
    %cst_17 = arith.constant 1.000000e+00 : f32
    %43 = vector.broadcast %cst_17 : f32 to vector<128x128xf32>
    %44 = arith.addf %43, %42 : vector<128x128xf32>
    %45 = arith.divf %43, %44 : vector<128x128xf32>
    %46 = vector.shape_cast %45 : vector<128x128xf32> to vector<8x16x128xf32>
    %47 = vector.shape_cast %35 : vector<8x128xf32> to vector<8x1x128xf32>
    %48 = vector.broadcast %47 : vector<8x1x128xf32> to vector<8x16x128xf32>
    %49 = arith.mulf %46, %48 : vector<8x16x128xf32>
    %50 = vector.shape_cast %49 : vector<8x16x128xf32> to vector<128x128xf32>
    %51 = arith.truncf %50 : vector<128x128xf32> to vector<128x128xbf16>
    %c0_18 = arith.constant 0 : index
    %c0_19 = arith.constant 0 : index
    %52 = vector.load %arg6[%c0_18, %c0_19] : memref<128x32xbf16, #tpu.memory_space<vmem>>, vector<128x32xbf16>
    %cst_20 = arith.constant dense<0.000000e+00> : vector<128x32xf32>
    %53 = tpu.matmul %51, %52, %cst_20 {dimension_numbers = #tpu.dot_dimension_numbers<[1], [0], [0], [1], [0, 0, 1, 1], [], []>} : vector<128x128xbf16>, vector<128x32xbf16>, vector<128x32xf32> -> vector<128x32xf32>
    %54 = vector.broadcast %5 : vector<1x32xf32> to vector<128x32xf32>
    %55 = arith.addf %53, %54 : vector<128x32xf32>
    %56 = arith.addf %29, %55 : vector<128x32xf32>
    %cst_21 = arith.constant dense<0.000000e+00> : vector<128xf32>
    %57 = vector.multi_reduction <add>, %56, %cst_21 [1] : vector<128x32xf32> to vector<128xf32>
    %58 = vector.shape_cast %57 : vector<128xf32> to vector<128x1xf32>
    %cst_22 = arith.constant 3.200000e+01 : f32
    %59 = vector.broadcast %cst_22 : f32 to vector<128x1xf32>
    %60 = arith.divf %58, %59 : vector<128x1xf32>
    %61 = vector.broadcast %60 : vector<128x1xf32> to vector<128x32xf32>
    %62 = arith.subf %56, %61 : vector<128x32xf32>
    %63 = arith.mulf %62, %62 : vector<128x32xf32>
    %cst_23 = arith.constant dense<0.000000e+00> : vector<128xf32>
    %64 = vector.multi_reduction <add>, %63, %cst_23 [1] : vector<128x32xf32> to vector<128xf32>
    %65 = vector.shape_cast %64 : vector<128xf32> to vector<128x1xf32>
    %cst_24 = arith.constant 3.200000e+01 : f32
    %66 = vector.broadcast %cst_24 : f32 to vector<128x1xf32>
    %67 = arith.divf %65, %66 : vector<128x1xf32>
    %68 = vector.broadcast %60 : vector<128x1xf32> to vector<128x32xf32>
    %69 = arith.subf %56, %68 : vector<128x32xf32>
    %cst_25 = arith.constant 9.99999974E-6 : f32
    %70 = vector.broadcast %cst_25 : f32 to vector<128x1xf32>
    %71 = arith.addf %67, %70 : vector<128x1xf32>
    %72 = math.rsqrt %71 : vector<128x1xf32>
    %73 = vector.broadcast %72 : vector<128x1xf32> to vector<128x32xf32>
    %74 = arith.mulf %69, %73 : vector<128x32xf32>
    %75 = vector.broadcast %3 : vector<1x32xf32> to vector<128x32xf32>
    %76 = arith.mulf %74, %75 : vector<128x32xf32>
    %77 = vector.broadcast %4 : vector<1x32xf32> to vector<128x32xf32>
    %78 = arith.addf %76, %77 : vector<128x32xf32>
    %79 = vector.shape_cast %78 : vector<128x32xf32> to vector<8x16x32xf32>
    %c0_26 = arith.constant 0 : index
    %c0_27 = arith.constant 0 : index
    %c0_28 = arith.constant 0 : index
    %80 = vector.load %arg7[%c0_26, %c0_27, %c0_28] : memref<8x16x32xf32, #tpu.memory_space<vmem>>, vector<8x16x32xf32>
    tpu.vector_store %arg7[%c0_26, %c0_27, %c0_28], %79 {strides = array<i32>} : memref<8x16x32xf32, #tpu.memory_space<vmem>>, vector<8x16x32xf32>,
    return
  }
  func.func @transform_0(%arg0: i32) -> (i32, i32, i32) {
    %c0_i32 = arith.constant 0 : i32
    %c0_i32_0 = arith.constant 0 : i32
    %c0_i32_1 = arith.constant 0 : i32
    return %arg0, %c0_i32, %c0_i32_0 : i32, i32, i32
  }
  func.func @transform_1(%arg0: i32) -> (i32, i32) {
    %c0_i32 = arith.constant 0 : i32
    %c0_i32_0 = arith.constant 0 : i32
    %c0_i32_1 = arith.constant 0 : i32
    return %c0_i32, %c0_i32_0 : i32, i32
  }
  func.func @transform_2(%arg0: i32) -> (i32, i32) {
    %c0_i32 = arith.constant 0 : i32
    %c0_i32_0 = arith.constant 0 : i32
    %c0_i32_1 = arith.constant 0 : i32
    return %c0_i32, %c0_i32_0 : i32, i32
  }
  func.func @transform_3(%arg0: i32) -> (i32, i32) {
    %c0_i32 = arith.constant 0 : i32
    %c0_i32_0 = arith.constant 0 : i32
    %c0_i32_1 = arith.constant 0 : i32
    return %c0_i32, %c0_i32_0 : i32, i32
  }
  func.func @transform_4(%arg0: i32) -> (i32, i32) {
    %c0_i32 = arith.constant 0 : i32
    %c0_i32_0 = arith.constant 0 : i32
    %c0_i32_1 = arith.constant 0 : i32
    return %c0_i32, %c0_i32_0 : i32, i32
  }
  func.func @transform_5(%arg0: i32) -> (i32, i32) {
    %c0_i32 = arith.constant 0 : i32
    %c0_i32_0 = arith.constant 0 : i32
    %c0_i32_1 = arith.constant 0 : i32
    return %c0_i32, %c0_i32_0 : i32, i32
  }
  func.func @transform_6(%arg0: i32) -> (i32, i32, i32) {
    %c0_i32 = arith.constant 0 : i32
    %c0_i32_0 = arith.constant 0 : i32
    %c0_i32_1 = arith.constant 0 : i32
    return %arg0, %c0_i32, %c0_i32_0 : i32, i32, i32
  }
}

</mosaic_0001>

<bundles_post_ra>
// kernel: axial_attention_forward.1
= control target key start
LH: loop header
LB: loop body
LE: loop exit
PB: predicated region body
PF: predicated region fallthrough
CT: control target
= control target key end

     0   :  { %11 = vsyncpa [#allocation3], 0  ;;  %s2942_s0 = inlined_call_operand.hbm [shape: f32[16,16,32], index: 0, kind: input, shape index: {}]   ;;  %s2943_s1 = inlined_call_operand.vmem [shape: f32[5,32], index: 1, kind: input, shape index: {}]   ;;  %s2944_s2 = inlined_call_operand.vmem [shape: f32[1,128], index: 2, kind: input, shape index: {}]   ;;  %s2945_s3 = inlined_call_operand.vmem [shape: bf16[32,128], index: 3, kind: input, shape index: {}]   ;;  %s2946_s4 = inlined_call_operand.vmem [shape: bf16[32,128], index: 4, kind: input, shape index: {}]   ;;  %s2947_s5 = inlined_call_operand.vmem [shape: bf16[128,32], index: 5, kind: input, shape index: {}]   ;;  %s2948_s6 = inlined_call_operand.hbm [shape: f32[16,16,32], index: 6, kind: output, shape index: {}]  }
   0x1   :  { %13 = vsyncpa [#allocation3 + $0x1], 0 }
   0x2   :  { %14 = vsyncpa [#allocation4], 0 }
   0x3   :  { %16 = vsyncpa [#allocation4 + $0x1], 0  ;;  %s2105_s21 = smov 0   ;;  %s2107_s22 = smov 0  }
   0x4   :  { %s2109_s23 = smov 0   ;;  %s2111_s24 = smov 0  }
   0x5 LB: > { %s2126_s25 = sadd.s32 4294967295, %s2059_s24   ;;  %s1606_s26 = sadd.s32 4294967294, %s2059_s24   ;;  %s2059_s24 = sphi %s2111_s24, %s2961_s24   ;;  %s2055_s23 = sphi %s2109_s23, %s2960_s23   ;;  %s2051_s22 = sphi %s2107_s22, %s2959_s22   ;;  %s2047_s21 = sphi %s2105_s21, %s2958_s21  }
   0x6   : > { %s2130_s27 = sadd.s32 1, %s2059_s24   ;;  %s29_s28 = sadd.s32 1, %s2055_s23 }
   0x7   : > { %s26_s29 = ssub.s32 %s2059_s24, %s2130_s27  ;;  %p36_p0 = scmp.ne.s32.totalorder %s2055_s23, %s2051_s22 }
   0x8   : > { %p27_p1 = scmp.eq.s32.totalorder %s26_s29, 0  ;;  %p37_p2 = scmp.eq.s32.totalorder %s2059_s24, 0 }
   0x9   : > { %p42_p3 = scmp.ne.s32.totalorder %s2051_s22, %s2047_s21  ;;  %p43_p4 = scmp.eq.s32.totalorder %s2126_s25, 0 }
   0xa   : > { %s2142_s30 = scalar_select %p27_p1, %s2055_s23, %s29_s28  }
   0xb   : > { %p2144_p5 = por %p37_p2, %p36_p0  ;;  %p2148_p6 = por %p43_p4, %p42_p3 }
   0xc   : > { %p171_p7 = scmp.eq.s32.totalorder %s2126_s25, 1  ;;  %p177_p8 = scmp.eq.s32.totalorder %s1606_s26, 1 }
   0xd   : > { %p1781_p10 = scmp.lt.s32.totalorder %s2059_s24, 2  ;;  %s212_s11 = sand.u32 1, %s2055_s23  }
   0xe   : > { %p2155_p11 = por %p171_p7, %p36_p0  ;;  %p2159_p12 = por %p177_p8, %p42_p3 }
   0xf   : > { %s1661_s12 = sshll.u32 %s2059_s24, 11  ;;  %s1609_s13 = sshll.u32 %s212_s11, 7 }
  0x10   : > { %s2952_s9 = scalar_select %p2155_p11, 1, 0 }
  0x11   : > { %s2953_s10 = scalar_select %p2159_p12, 1, 0 }
  0x12   : > { %s2168_s16 = scalar_lea.hbm %s2942_s0, %s1661_s12  ;;  %s216_s17 = scalar_lea.vmem [#allocation2], %s1609_s13 }
  0x13   : > { %s224_s18 = sshll.u32 %s216_s17, 4  ;;  %p2172_p13 = pnand %p1781_p10, %p2144_p5  ;;  %s2176_s18 = int_to_ptr.vmem [resolvable:$true] %s224_s18 }
  0x14   : > { %s2178_s20 = scalar_lea.sflag [#allocation3], %s212_s11  ;;  %s1963_s26 = scalar_lea.hbm %s2168_s16, 2048 }
  0x15   : > { %p1964_p0 = scmp.ne.s32.totalorder %s2168_s16, %s1963_s26  ;;  %p1965_p1 = pneg %p2172_p13 }
  0x16   : > { %s1968_s7 = scalar_lea.hbm %s2942_s0, 4096  ;;  %p1969_p4 = scmp.lt.u32.totalorder %s2168_s16, %s2942_s0 }
  0x17   : > { %p1966_p2 = pnand %p1965_p1, %p1964_p0  ;;  %p1970_p5 = scmp.lt.u32.totalorder %s1968_s7, %s1963_s26 }
  0x18   : > { %p1972_p8 = scmp.lt.u32.totalorder %s1963_s26, %s2168_s16 }
  0x19   : > { %p1967_p3 = pneg %p1966_p2  ;;  %p1971_p7 = por %p1970_p5, %p1969_p4 }
  0x1b   : > { %p1973_p10 = por %p1972_p8, %p1971_p7 }
  0x1d   : > { %p1974_p9 = pnand %p1973_p10, %p1967_p3 }
  0x1f   : > { %1977 = shalt.err (!%p1974_p9)
}
  0x20   : > { %s1978_s11 = scalar_lea.vmem %s2176_s18, 2048  ;;  %s2061_s14 = smov [#allocation2]  }
  0x21   : > { %p1979_p0 = scmp.ne.s32.totalorder %s2176_s18, %s1978_s11  ;;  %s1983_s15 = sshll.u32 %s2061_s14, 4  ;;  %s1984_s15 = int_to_ptr.vmem [resolvable:$false] %s1983_s15 }
  0x22   : > { %s1985_s17 = scalar_lea.vmem %s1984_s15, 4096  ;;  %p1986_p11 = scmp.lt.s32.totalorder %s2176_s18, %s1984_s15 }
  0x23   : > { %p1981_p2 = pnand %p1979_p0, %p1965_p1  ;;  %p1987_p4 = scmp.lt.s32.totalorder %s1985_s17, %s1978_s11 }
  0x25   : > { %p1982_p12 = pneg %p1981_p2  ;;  %p1988_p5 = por %p1987_p4, %p1986_p11 }
  0x27   : > { %p1989_p7 = pnand %p1988_p5, %p1982_p12 }
  0x29   : > { %1992 = shalt.err (!%p1989_p7)
}
  0x2a   : > { %s2062_s26 = smov 128   ;;  %s2063_s28 = smov 8  }
  0x2b   : > { %1776 = dma.hbm_to_vmem [thread:$0]  (!%p2172_p13), %s2168_s16, 2048, %s2176_s18, %s2178_s20, %s2062_s26, %s2062_s26, %s2063_s28  }
  0x2c   : > { %p1613_p9 = scmp.ge.s32.totalorder %s2059_s24, 1  ;;  %p232_p1 = scmp.lt.s32.totalorder %s2059_s24, 3 }
  0x2e   : > { %p233_p3 = pnand %p1613_p9, %p232_p1 }
  0x2f   : > { %s2209_s29 = sand.u32 (!%p233_p3), 1, %s2051_s22  }
  0x30   : > { %236 = sbr.rel (%p233_p3) target bundleno = 1223 (0x4c7), region = 44  ;;  %s1614_s7 = sshll.u32 (!%p233_p3), %s2209_s29, 7 }
  0x31   : > { %s239_s12 = scalar_lea.sflag (!%p233_p3), [#allocation3], %s2209_s29  ;;  %s2215_s13 = scalar_lea.vmem (!%p233_p3), [#allocation2], %s1614_s7 }
  0x37   : > { %2038 = dma.done.wait (%p2148_p6), %s239_s12, 2048  }
  0x38   : > { %2040 = vsyncadd (%p2148_p6), %s239_s12, 4294965248  ;;  %vm291_vm0 = vcmask 261120   ;;  %v275_v0 = vld [vmem:[%s2215_s13] sm:$0xff]  ;;  %v277_v1 = vld [vmem:[%s2215_s13 + $0x10] sm:$0xff]  ;;  %vm2065_vm1 = vmmov 0   ;;  %vm649_vm2 = vcmask 1041409  }
  0x39   : > { %v276_v2 = vld [vmem:[%s2215_s13 + $0x8] sm:$0xff]  ;;  %v292_v3 = vsel %vm291_vm0, %v275_v0, 0.0  ;;  %v298_v4 = vsel %vm291_vm0, %v277_v1, 0.0  ;;  %v278_v5 = vld [vmem:[%s2215_s13 + $0x18] sm:$0xff]  ;;  %v2228_v6 = vld [vmem:[%s2215_s13 + $0x20] sm:$0xff]  ;;  %vm651_vm3 = vcmask 1042434  }
  0x3a   : > { %293 = vadd.xlane.f32.xlu0 %v292_v3  ;;  %299 = vadd.xlane.f32.xlu1 %v298_v4  ;;  %v2231_v7 = vld [vmem:[%s2215_s13 + $0x28] sm:$0xff]  ;;  %v295_v8 = vsel %vm291_vm0, %v276_v2, 0.0  ;;  %v301_v9 = vsel %vm291_vm0, %v278_v5, 0.0  ;;  %v2236_v10 = vld [vmem:[%s2215_s13 + $0x30] sm:$0xff]  ;;  %v2239_v11 = vld [vmem:[%s2215_s13 + $0x38] sm:$0xff]  ;;  %v304_v12 = vsel %vm291_vm0, %v2228_v6, 0.0 }
  0x3b   : > { %v307_v13 = vsel %vm291_vm0, %v2231_v7, 0.0  ;;  %v310_v14 = vsel %vm291_vm0, %v2236_v10, 0.0  ;;  %v313_v15 = vsel %vm291_vm0, %v2239_v11, 0.0  ;;  %v2250_v16 = vld [vmem:[%s2215_s13 + $0x40] sm:$0xff]  ;;  %v2253_v17 = vld [vmem:[%s2215_s13 + $0x48] sm:$0xff]  ;;  %v2260_v20 = vld [vmem:[%s2215_s13 + $0x50] sm:$0xff] }
  0x3c   : > { %v316_v18 = vsel %vm291_vm0, %v2250_v16, 0.0  ;;  %v319_v19 = vsel %vm291_vm0, %v2253_v17, 0.0  ;;  %v2263_v21 = vld [vmem:[%s2215_s13 + $0x58] sm:$0xff]  ;;  %v322_v22 = vsel %vm291_vm0, %v2260_v20, 0.0  ;;  %v2270_v24 = vld [vmem:[%s2215_s13 + $0x60] sm:$0xff]  ;;  %v2273_v25 = vld [vmem:[%s2215_s13 + $0x68] sm:$0xff] }
  0x3d   : > { %v325_v23 = vsel %vm291_vm0, %v2263_v21, 0.0  ;;  %v328_v26 = vsel %vm291_vm0, %v2270_v24, 0.0  ;;  %v331_v27 = vsel %vm291_vm0, %v2273_v25, 0.0  ;;  %v2280_v28 = vld [vmem:[%s2215_s13 + $0x70] sm:$0xff]  ;;  %v2283_v29 = vld [vmem:[%s2215_s13 + $0x78] sm:$0xff]  ;;  %vm653_vm4 = vcmask 1043459  }
  0x3e   : > { %296 = vadd.xlane.f32.xlu0 %v295_v8  ;;  %302 = vadd.xlane.f32.xlu1 %v301_v9  ;;  %v334_v30 = vsel %vm291_vm0, %v2280_v28, 0.0  ;;  %v337_v31 = vsel %vm291_vm0, %v2283_v29, 0.0  ;;  %vm655_vm5 = vcmask 1044484   ;;  %vm657_vm6 = vcmask 1045509   ;;  %s2815_s20 = scalar_lea.vmem [#allocation5], %s1614_s7  ;;  %s1663_s7 = sshll.u32 %s2126_s25, 11 }
  0x3f   : > { %vm659_vm7 = vcmask 1046534   ;;  %vm661_vm8 = vcmask 1047559   ;;  %s1533_s11 = sshll.u32 %s2815_s20, 4  ;;  %s2891_s17 = scalar_lea.hbm %s2948_s6, %s1663_s7  ;;  %s2893_s11 = int_to_ptr.vmem [resolvable:$true] %s1533_s11 }
  0x40   : > { %s1519_s25 = scalar_lea.sflag [#allocation4], %s2209_s29  ;;  %s1993_s26 = scalar_lea.vmem %s2893_s11, 2048 }
  0x41   : > { %p1994_p6 = scmp.ne.s32.totalorder %s2893_s11, %s1993_s26  ;;  %p2955_p11 = scmp.ne.s32.totalorder %s2952_s9, 0 }
  0x42   : > { %305 = vadd.xlane.f32.xlu0 %v304_v12  ;;  %308 = vadd.xlane.f32.xlu1 %v307_v13  ;;  %s2067_s28 = smov [#allocation5]  }
  0x43   : > { %p1995_p12 = pnand %p1994_p6, %p2955_p11  ;;  %s1997_s12 = sshll.u32 %s2067_s28, 4  ;;  %s1998_s12 = int_to_ptr.vmem [resolvable:$false] %s1997_s12 }
  0x44   : > { %s1999_s13 = scalar_lea.vmem %s1998_s12, 4096  ;;  %p2000_p8 = scmp.lt.s32.totalorder %s2893_s11, %s1998_s12 }
  0x45   : > { %p1996_p13 = pneg %p1995_p12  ;;  %p2001_p10 = scmp.lt.s32.totalorder %s1999_s13, %s1993_s26 }
  0x46   : > { %311 = vadd.xlane.f32.xlu0 %v310_v14  ;;  %314 = vadd.xlane.f32.xlu1 %v313_v15 }
  0x47   : > { %p2002_p0 = por %p2001_p10, %p2000_p8 }
  0x49   : > { %p2003_p2 = pnand %p2002_p0, %p1996_p13 }
  0x4a   : > { %317 = vadd.xlane.f32.xlu0 %v316_v18  ;;  %320 = vadd.xlane.f32.xlu1 %v319_v19 }
  0x4e   : > { %323 = vadd.xlane.f32.xlu0 %v322_v22  ;;  %326 = vadd.xlane.f32.xlu1 %v325_v23 }
  0x52   : > { %329 = vadd.xlane.f32.xlu0 %v328_v26  ;;  %332 = vadd.xlane.f32.xlu1 %v331_v27 }
  0x56   : > { %335 = vadd.xlane.f32.xlu0 %v334_v30  ;;  %338 = vadd.xlane.f32.xlu1 %v337_v31 }
  0xc7   : > { %v294_v32 = vpop.xlane.xlu0 %293  ;;  %v300_v33 = vpop.xlane.xlu1 %299 }
  0xc8   : > { %v341_v34 = vmul.f32 0.03125, %v294_v32  ;;  %v343_v35 = vmul.f32 0.03125, %v300_v33 }
  0xca   : > { %v2289_v36 = vsub.f32 %v275_v0, %v341_v34  ;;  %v2291_v37 = vsub.f32 %v277_v1, %v343_v35 }
  0xcb   : > { %v297_v38 = vpop.xlane.xlu0 %296  ;;  %v303_v39 = vpop.xlane.xlu1 %302 }
  0xcc   : > { %v342_v40 = vmul.f32 0.03125, %v297_v38  ;;  %v344_v41 = vmul.f32 0.03125, %v303_v39  ;;  %v373_v42 = vmul.f32 %v2289_v36, %v2289_v36  ;;  %v375_v43 = vmul.f32 %v2291_v37, %v2291_v37 }
  0xce   : > { %v2297_v44 = vsub.f32 %v276_v2, %v342_v40  ;;  %v2299_v45 = vsub.f32 %v278_v5, %v344_v41  ;;  %v389_v46 = vsel %vm291_vm0, %v373_v42, 0.0  ;;  %v395_v49 = vsel %vm291_vm0, %v375_v43, 0.0 }
  0xcf   : > { %390 = vadd.xlane.f32.xlu0 %v389_v46  ;;  %v306_v47 = vpop.xlane.xlu0 %305  ;;  %v309_v48 = vpop.xlane.xlu1 %308 }
  0xd0   : > { %v345_v50 = vmul.f32 0.03125, %v306_v47  ;;  %v346_v51 = vmul.f32 0.03125, %v309_v48  ;;  %v374_v52 = vmul.f32 %v2297_v44, %v2297_v44  ;;  %v376_v53 = vmul.f32 %v2299_v45, %v2299_v45 }
  0xd2   : > { %v2308_v54 = vsub.f32 %v2228_v6, %v345_v50  ;;  %v2311_v55 = vsub.f32 %v2231_v7, %v346_v51  ;;  %v392_v56 = vsel %vm291_vm0, %v374_v52, 0.0  ;;  %v398_v59 = vsel %vm291_vm0, %v376_v53, 0.0  ;;  %v1823_v53 = vld [vmem:[%s2946_s4 + $0x8] sm:$0xff]  }
  0xd3   : > { %396 = vadd.xlane.f32.xlu0 %v395_v49  ;;  %393 = vadd.xlane.f32.xlu1 %v392_v56  ;;  %v312_v57 = vpop.xlane.xlu0 %311  ;;  %v315_v58 = vpop.xlane.xlu1 %314  ;;  %v1824_v56 = vld [vmem:[%s2945_s3] sm:$0xff]  }
  0xd4   : > { %v347_v60 = vmul.f32 0.03125, %v312_v57  ;;  %v348_v61 = vmul.f32 0.03125, %v315_v58  ;;  %v377_v62 = vmul.f32 %v2308_v54, %v2308_v54  ;;  %v378_v63 = vmul.f32 %v2311_v55, %v2311_v55  ;;  %v1825_v58 = vld [vmem:[%s2945_s3 + $0x8] sm:$0xff]  }
  0xd5   : > { %v2064_v57 = vmov 0.0  }
  0xd6   : > { %v2320_v0 = vsub.f32 %v2236_v10, %v347_v60  ;;  %v2323_v1 = vsub.f32 %v2239_v11, %v348_v61  ;;  %v401_v2 = vsel %vm291_vm0, %v377_v62, 0.0  ;;  %v404_v5 = vsel %vm291_vm0, %v378_v63, 0.0  ;;  %1693 = vmatprep.subr.bf16.mxu0 %v2064_v57  ;;  %1697 = vmatprep.mubr.msk.bf16.mxu0 %vm2065_vm1, %v2064_v57 }
  0xd7   : > { %399 = vadd.xlane.f32.xlu1 %v398_v59  ;;  %402 = vadd.xlane.f32.xlu0 %v401_v2  ;;  %v318_v3 = vpop.xlane.xlu0 %317  ;;  %v321_v4 = vpop.xlane.xlu1 %320  ;;  %v501_v62 = vlaneseq }
  0xd8   : > { %v349_v6 = vmul.f32 0.03125, %v318_v3  ;;  %v350_v7 = vmul.f32 0.03125, %v321_v4  ;;  %v379_v8 = vmul.f32 %v2320_v0, %v2320_v0  ;;  %v380_v9 = vmul.f32 %v2323_v1, %v2323_v1  ;;  %1694 = vmatpush3.bf16.msra.mxu0 %v1824_v56 }
  0xd9   : > { %1695 = vmatprep.subr.bf16.mxu0 %v2064_v57 }
  0xda   : > { %v2332_v10 = vsub.f32 %v2250_v16, %v349_v6  ;;  %v2335_v11 = vsub.f32 %v2253_v17, %v350_v7  ;;  %v407_v12 = vsel %vm291_vm0, %v379_v8, 0.0  ;;  %v410_v15 = vsel %vm291_vm0, %v380_v9, 0.0 }
  0xdb   : > { %405 = vadd.xlane.f32.xlu1 %v404_v5  ;;  %408 = vadd.xlane.f32.xlu0 %v407_v12  ;;  %v324_v13 = vpop.xlane.xlu0 %323  ;;  %v327_v14 = vpop.xlane.xlu1 %326  ;;  %v2393_v7 = vshrl.u32 %v501_v62, 7 }
  0xdc   : > { %v351_v18 = vmul.f32 0.03125, %v324_v13  ;;  %v352_v19 = vmul.f32 0.03125, %v327_v14  ;;  %v381_v22 = vmul.f32 %v2332_v10, %v2332_v10  ;;  %v382_v16 = vmul.f32 %v2335_v11, %v2335_v11  ;;  %1696 = vmatpush3.bf16.msra.mxu0 %v1825_v58 }
  0xde   : > { %v2344_v23 = vsub.f32 %v2260_v20, %v351_v18  ;;  %v2347_v17 = vsub.f32 %v2263_v21, %v352_v19  ;;  %v413_v26 = vsel %vm291_vm0, %v381_v22, 0.0  ;;  %v416_v31 = vsel %vm291_vm0, %v382_v16, 0.0  ;;  %v2401_v16 = vld [vmem:[%s2943_s1] sm:$0x1f] }
  0xdf   : > { %411 = vadd.xlane.f32.xlu1 %v410_v15  ;;  %414 = vadd.xlane.f32.xlu0 %v413_v26  ;;  %v330_v27 = vpop.xlane.xlu0 %329  ;;  %v333_v30 = vpop.xlane.xlu1 %332  ;;  %v2396_v18 = vsub.s32 0, %v2393_v7 }
  0xe0   : > { %v353_v32 = vmul.f32 0.03125, %v330_v27  ;;  %v354_v33 = vmul.f32 0.03125, %v333_v30  ;;  %v383_v34 = vmul.f32 %v2344_v23, %v2344_v23  ;;  %v384_v20 = vmul.f32 %v2347_v17, %v2347_v17 }
  0xe2   : > { %v2356_v35 = vsub.f32 %v2270_v24, %v353_v32  ;;  %v2359_v21 = vsub.f32 %v2273_v25, %v354_v33  ;;  %v419_v38 = vsel %vm291_vm0, %v383_v34, 0.0  ;;  %v422_v41 = vsel %vm291_vm0, %v384_v20, 0.0 }
  0xe3   : > { %417 = vadd.xlane.f32.xlu1 %v416_v31  ;;  %420 = vadd.xlane.f32.xlu0 %v419_v38  ;;  %v336_v39 = vpop.xlane.xlu0 %335  ;;  %v339_v40 = vpop.xlane.xlu1 %338  ;;  %v2405_v33 = vrot.slane %v2401_v16, %v2396_v18  ;;  %v523_v34 = vsub.s32 1, %v2393_v7 }
  0xe4   : > { %v355_v42 = vmul.f32 0.03125, %v336_v39  ;;  %v356_v43 = vmul.f32 0.03125, %v339_v40  ;;  %v385_v46 = vmul.f32 %v2356_v35, %v2356_v35  ;;  %v386_v24 = vmul.f32 %v2359_v21, %v2359_v21 }
  0xe6   : > { %v2368_v47 = vsub.f32 %v2280_v28, %v355_v42  ;;  %v2371_v25 = vsub.f32 %v2283_v29, %v356_v43  ;;  %v425_v48 = vsel %vm291_vm0, %v385_v46, 0.0  ;;  %v428_v49 = vsel %vm291_vm0, %v386_v24, 0.0  ;;  %v1822_v29 = vld [vmem:[%s2946_s4] sm:$0xff]  }
  0xe7   : > { %423 = vadd.xlane.f32.xlu1 %v422_v41  ;;  %426 = vadd.xlane.f32.xlu0 %v425_v48  ;;  %v2411_v48 = vrot.slane %v2401_v16, %v523_v34 }
  0xe8   : > { %v387_v50 = vmul.f32 %v2368_v47, %v2368_v47  ;;  %v388_v51 = vmul.f32 %v2371_v25, %v2371_v25  ;;  %1701 = vmatprep.subr.bf16.mxu1 %v1822_v29 }
  0xe9   : > { %1702 = vmatpush3.bf16.msra.mxu1 %v1822_v29 }
  0xea   : > { %v431_v52 = vsel %vm291_vm0, %v387_v50, 0.0  ;;  %v434_v28 = vsel %vm291_vm0, %v388_v51, 0.0  ;;  %1703 = vmatprep.subr.bf16.mxu1 %v1823_v53 }
  0xeb   : > { %429 = vadd.xlane.f32.xlu1 %v428_v49  ;;  %432 = vadd.xlane.f32.xlu0 %v431_v52 }
  0xed   : > { %1704 = vmatpush3.bf16.msra.mxu1 %v1823_v53 }
  0xef   : > { %435 = vadd.xlane.f32.xlu1 %v434_v28 }
 0x15c   : > { %v391_v59 = vpop.xlane.xlu0 %390 }
 0x15d   : > { %v437_v60 = vmul.f32 0.03125, %v391_v59 }
 0x15f   : > { %v453_v61 = vadd.f32 1e-05, %v437_v60 }
 0x160   : > { %v394_v63 = vpop.xlane.xlu1 %393  ;;  %v397_v2 = vpop.xlane.xlu0 %396 }
 0x161   : > { %1834 = vrsqrt.f32 %v453_v61  ;;  %v438_v3 = vmul.f32 0.03125, %v394_v63  ;;  %v439_v4 = vmul.f32 0.03125, %v397_v2 }
 0x163   : > { %v454_v5 = vadd.f32 1e-05, %v438_v3  ;;  %v455_v6 = vadd.f32 1e-05, %v439_v4 }
 0x164   : > { %v400_v8 = vpop.xlane.xlu1 %399  ;;  %v403_v9 = vpop.xlane.xlu0 %402 }
 0x165   : > { %1836 = vrsqrt.f32 %v454_v5  ;;  %v440_v12 = vmul.f32 0.03125, %v400_v8  ;;  %v441_v13 = vmul.f32 0.03125, %v403_v9 }
 0x166   : > { %1838 = vrsqrt.f32 %v455_v6 }
 0x167   : > { %v456_v14 = vadd.f32 1e-05, %v440_v12  ;;  %v457_v15 = vadd.f32 1e-05, %v441_v13 }
 0x168   : > { %v406_v19 = vpop.xlane.xlu1 %405  ;;  %v409_v22 = vpop.xlane.xlu0 %408 }
 0x169   : > { %1840 = vrsqrt.f32 %v456_v14  ;;  %v442_v26 = vmul.f32 0.03125, %v406_v19  ;;  %v443_v27 = vmul.f32 0.03125, %v409_v22 }
 0x16a   : > { %1842 = vrsqrt.f32 %v457_v15 }
 0x16b   : > { %v1835_v30 = vpop.eup %1834  ;;  %v458_v31 = vadd.f32 1e-05, %v442_v26  ;;  %v459_v32 = vadd.f32 1e-05, %v443_v27 }
 0x16c   : > { %v412_v20 = vpop.xlane.xlu1 %411  ;;  %v415_v38 = vpop.xlane.xlu0 %414  ;;  %v485_v39 = vmul.f32 %v1835_v30, %v2289_v36 }
 0x16d   : > { %1844 = vrsqrt.f32 %v458_v31  ;;  %v444_v40 = vmul.f32 0.03125, %v412_v20  ;;  %v445_v41 = vmul.f32 0.03125, %v415_v38 }
 0x16e   : > { %1846 = vrsqrt.f32 %v459_v32  ;;  %v505_v24 = vmul.f32 %v2405_v33, %v485_v39 }
 0x16f   : > { %v1837_v42 = vpop.eup %1836  ;;  %v460_v43 = vadd.f32 1e-05, %v444_v40  ;;  %v461_v46 = vadd.f32 1e-05, %v445_v41 }
 0x170   : > { %v1839_v49 = vpop.eup %1838  ;;  %v418_v50 = vpop.xlane.xlu1 %417  ;;  %v486_v52 = vmul.f32 %v1837_v42, %v2297_v44  ;;  %v2417_v59 = vadd.f32 %v2411_v48, %v505_v24 }
 0x171   : > { %v421_v51 = vpop.xlane.xlu0 %420  ;;  %v487_v28 = vmul.f32 %v1839_v49, %v2291_v37  ;;  %1848 = vrsqrt.f32 %v460_v43  ;;  %v446_v36 = vmul.f32 0.03125, %v418_v50 }
 0x172   : > { %v447_v29 = vmul.f32 0.03125, %v421_v51  ;;  %1850 = vrsqrt.f32 %v461_v46  ;;  %v506_v53 = vmul.f32 %v2405_v33, %v486_v52  ;;  %v549_v13 = vsel %vm291_vm0, %v2417_v59, 0.0 }
 0x173   : > { %v1841_v56 = vpop.eup %1840  ;;  %v462_v57 = vadd.f32 1e-05, %v446_v36  ;;  %v507_v60 = vmul.f32 %v2405_v33, %v487_v28 }
 0x174   : > { %v463_v58 = vadd.f32 1e-05, %v447_v29  ;;  %v1843_v61 = vpop.eup %1842  ;;  %v488_v62 = vmul.f32 %v1841_v56, %v2299_v45  ;;  %v424_v44 = vpop.xlane.xlu1 %423  ;;  %v2422_v37 = vadd.f32 %v2411_v48, %v506_v53 }
 0x175   : > { %v427_v63 = vpop.xlane.xlu0 %426  ;;  %v489_v2 = vmul.f32 %v1843_v61, %v2308_v54  ;;  %1852 = vrsqrt.f32 %v462_v57  ;;  %v448_v3 = vmul.f32 0.03125, %v424_v44  ;;  %v2433_v54 = vadd.f32 %v2411_v48, %v507_v60 }
 0x176   : > { %v449_v4 = vmul.f32 0.03125, %v427_v63  ;;  %1854 = vrsqrt.f32 %v463_v58  ;;  %v541_v5 = vpack.c.bf16 %v2422_v37, %v2417_v59  ;;  %v550_v6 = vsel %vm291_vm0, %v2422_v37, 0.0 }
 0x177   : > { %v508_v8 = vmul.f32 %v2405_v33, %v488_v62  ;;  %v1845_v45 = vpop.eup %1844  ;;  %v464_v9 = vadd.f32 1e-05, %v448_v3  ;;  %v551_v26 = vadd.f32 %v550_v6, %v549_v13  ;;  %v509_v30 = vmul.f32 %v2405_v33, %v489_v2 }
 0x178   : > { %v465_v12 = vadd.f32 1e-05, %v449_v4  ;;  %v1847_v14 = vpop.eup %1846  ;;  %v490_v15 = vmul.f32 %v1845_v45, %v2311_v55  ;;  %v430_v19 = vpop.xlane.xlu1 %429  ;;  %1705 = vmatprep.mubr.msk.bf16.mxu1 %vm291_vm0, %v541_v5  ;;  %v558_v55 = vsel %vm291_vm0, %v2433_v54, 0.0 }
 0x179   : > { %v433_v22 = vpop.xlane.xlu0 %432  ;;  %v2438_v27 = vadd.f32 %v2411_v48, %v508_v8  ;;  %1856 = vrsqrt.f32 %v464_v9  ;;  %v450_v31 = vmul.f32 0.03125, %v430_v19  ;;  %v491_v34 = vmul.f32 %v1847_v14, %v2320_v0 }
 0x17a   : > { %v451_v32 = vmul.f32 0.03125, %v433_v22  ;;  %1858 = vrsqrt.f32 %v465_v12  ;;  %v510_v42 = vmul.f32 %v2405_v33, %v490_v15  ;;  %v552_v46 = vrot.slane %v551_v26, 4 }
 0x17b   : > { %v542_v20 = vpack.c.bf16 %v2438_v27, %v2433_v54  ;;  %v1849_v38 = vpop.eup %1848  ;;  %v466_v39 = vadd.f32 1e-05, %v450_v31  ;;  %v559_v41 = vsel %vm291_vm0, %v2438_v27, 0.0  ;;  %v2451_v0 = vadd.f32 %v2411_v48, %v509_v30 }
 0x17c   : > { %v467_v40 = vadd.f32 1e-05, %v451_v32  ;;  %v1851_v43 = vpop.eup %1850  ;;  %v436_v24 = vpop.xlane.xlu1 %435  ;;  %v560_v49 = vadd.f32 %v559_v41, %v558_v55  ;;  %v492_v50 = vmul.f32 %v1849_v38, %v2323_v1  ;;  %v2455_v52 = vadd.f32 %v2411_v48, %v510_v42 }
 0x17d   : > { %1706 = vmatmul.mubr.msk.bf16.vlgmr.msra.gmra.mrb[0].mxu1 %vm291_vm0, %v542_v20  ;;  %1860 = vrsqrt.f32 %v466_v39  ;;  %v452_v51 = vmul.f32 0.03125, %v436_v24  ;;  %v493_v28 = vmul.f32 %v1851_v43, %v2332_v10  ;;  %v567_v29 = vsel %vm291_vm0, %v2451_v0, 0.0 }
 0x17e   : > { %1862 = vrsqrt.f32 %v467_v40  ;;  %v561_v36 = vrot.slane %v560_v49, 4  ;;  %v543_v57 = vpack.c.bf16 %v2455_v52, %v2451_v0  ;;  %v568_v1 = vsel %vm291_vm0, %v2455_v52, 0.0 }
 0x17f   : > { %v1853_v53 = vpop.eup %1852  ;;  %v468_v56 = vadd.f32 1e-05, %v452_v51  ;;  %v511_v58 = vmul.f32 %v2405_v33, %v491_v34  ;;  %v569_v62 = vadd.f32 %v568_v1, %v567_v29  ;;  %v512_v44 = vmul.f32 %v2405_v33, %v492_v50 }
 0x180   : > { %v1855_v60 = vpop.eup %1854  ;;  %v494_v61 = vmul.f32 %v1853_v53, %v2335_v11  ;;  %1709 = vmatprep.mubr.msk.bf16.mxu1 %vm291_vm0, %v543_v57  ;;  %v553_v2 = vadd.f32 %v552_v46, %v551_v26  ;;  %v513_v4 = vmul.f32 %v2405_v33, %v493_v28  ;;  %v562_v6 = vadd.f32 %v561_v36, %v560_v49 }
 0x181   : > { %v495_v10 = vmul.f32 %v1855_v60, %v2344_v23  ;;  %1864 = vrsqrt.f32 %v468_v56  ;;  %v2470_v63 = vadd.f32 %v2411_v48, %v511_v58  ;;  %v570_v3 = vrot.slane %v569_v62, 4 }
 0x182   : > { %v2474_v8 = vadd.f32 %v2411_v48, %v512_v44  ;;  %v514_v11 = vmul.f32 %v2405_v33, %v494_v61  ;;  %v2486_v19 = vadd.f32 %v2411_v48, %v513_v4  ;;  %v554_v22 = vrot.slane %v553_v2, 2 }
 0x183   : > { %v1857_v5 = vpop.eup %1856  ;;  %v571_v9 = vadd.f32 %v570_v3, %v569_v62  ;;  %v515_v12 = vmul.f32 %v2405_v33, %v495_v10  ;;  %v576_v14 = vsel %vm291_vm0, %v2470_v63, 0.0  ;;  %v563_v31 = vrot.slane %v562_v6, 2 }
 0x184   : > { %v1859_v23 = vpop.eup %1858  ;;  %v496_v45 = vmul.f32 %v1857_v5, %v2347_v17  ;;  %v544_v13 = vpack.c.bf16 %v2474_v8, %v2470_v63  ;;  %v577_v15 = vsel %vm291_vm0, %v2474_v8, 0.0  ;;  %v2491_v32 = vadd.f32 %v2411_v48, %v514_v11 }
 0x185   : > { %v578_v26 = vadd.f32 %v577_v15, %v576_v14  ;;  %v497_v17 = vmul.f32 %v1859_v23, %v2356_v35  ;;  %v572_v38 = vrot.slane %v571_v9, 2  ;;  %v2496_v39 = vadd.f32 %v2411_v48, %v515_v12 }
 0x186   : > { %1710 = vmatmul.mubr.msk.bf16.gmra.mrb[4].mxu1 %vm291_vm0, %v544_v13  ;;  %v516_v34 = vmul.f32 %v2405_v33, %v496_v45  ;;  %v545_v41 = vpack.c.bf16 %v2491_v32, %v2486_v19  ;;  %v585_v35 = vsel %vm291_vm0, %v2486_v19, 0.0  ;;  %v586_v42 = vsel %vm291_vm0, %v2491_v32, 0.0 }
 0x187   : > { %v1861_v30 = vpop.eup %1860  ;;  %v579_v40 = vrot.slane %v578_v26, 4  ;;  %v555_v46 = vadd.f32 %v554_v22, %v553_v2  ;;  %v587_v24 = vadd.f32 %v586_v42, %v585_v35  ;;  %v564_v50 = vadd.f32 %v563_v31, %v562_v6 }
 0x188   : > { %v1863_v20 = vpop.eup %1862  ;;  %v498_v55 = vmul.f32 %v1861_v30, %v2359_v21  ;;  %v2506_v21 = vadd.f32 %v2411_v48, %v516_v34  ;;  %1713 = vmatprep.mubr.msk.bf16.mxu1 %vm291_vm0, %v545_v41  ;;  %v517_v28 = vmul.f32 %v2405_v33, %v497_v17  ;;  %v573_v53 = vadd.f32 %v572_v38, %v571_v9 }
 0x189   : > { %v499_v43 = vmul.f32 %v1863_v20, %v2368_v47  ;;  %v580_v51 = vadd.f32 %v579_v40, %v578_v26  ;;  %v588_v56 = vrot.slane %v587_v24, 4  ;;  %v594_v47 = vsel %vm291_vm0, %v2496_v39, 0.0 }
 0x18a   : > { %v518_v36 = vmul.f32 %v2405_v33, %v498_v55  ;;  %v546_v1 = vpack.c.bf16 %v2506_v21, %v2496_v39  ;;  %v595_v58 = vsel %vm291_vm0, %v2506_v21, 0.0  ;;  %v2519_v60 = vadd.f32 %v2411_v48, %v517_v28 }
 0x18b   : > { %v1865_v49 = vpop.eup %1864  ;;  %v581_v57 = vrot.slane %v580_v51, 2  ;;  %v589_v61 = vadd.f32 %v588_v56, %v587_v24  ;;  %v596_v62 = vadd.f32 %v595_v58, %v594_v47  ;;  %v565_v44 = vrot.slane %v564_v50, 1 }
 0x18c   : > { %v500_v29 = vmul.f32 %v1865_v49, %v2371_v25  ;;  %v2522_v10 = vadd.f32 %v2411_v48, %v518_v36  ;;  %v519_v25 = vmul.f32 %v2405_v33, %v499_v43  ;;  %v603_v3 = vsel %vm291_vm0, %v2519_v60, 0.0 }
 0x18d   : > { %v582_v2 = vadd.f32 %v581_v57, %v580_v51  ;;  %v590_v5 = vrot.slane %v589_v61, 2  ;;  %v597_v6 = vrot.slane %v596_v62, 4  ;;  %v574_v45 = vrot.slane %v573_v53, 1 }
 0x18e   : > { %1714 = vmatmul.mubr.msk.bf16.gmra.mrb[8].mxu1 %vm291_vm0, %v546_v1  ;;  %v520_v4 = vmul.f32 %v2405_v33, %v500_v29  ;;  %v547_v11 = vpack.c.bf16 %v2522_v10, %v2519_v60  ;;  %v604_v23 = vsel %vm291_vm0, %v2522_v10, 0.0  ;;  %v2534_v12 = vadd.f32 %v2411_v48, %v519_v25 }
 0x18f   : > { %v605_v9 = vadd.f32 %v604_v23, %v603_v3  ;;  %v556_v14 = vrot.slane %v555_v46, 1  ;;  %v583_v15 = vrot.slane %v582_v2, 1  ;;  %v591_v22 = vadd.f32 %v590_v5, %v589_v61 }
 0x190   : > { %v2537_v13 = vadd.f32 %v2411_v48, %v520_v4  ;;  %v598_v33 = vadd.f32 %v597_v6, %v596_v62  ;;  %1717 = vmatprep.mubr.msk.bf16.mxu1 %vm291_vm0, %v547_v11  ;;  %v612_v17 = vsel %vm291_vm0, %v2534_v12, 0.0  ;;  %v566_v34 = vadd.f32 %v565_v44, %v564_v50 }
 0x191   : > { %v606_v26 = vrot.slane %v605_v9, 4  ;;  %v592_v55 = vrot.slane %v591_v22, 1  ;;  %v575_v38 = vadd.f32 %v574_v45, %v573_v53  ;;  %v557_v41 = vadd.f32 %v556_v14, %v555_v46 }
 0x192   : > { %v548_v30 = vpack.c.bf16 %v2537_v13, %v2534_v12  ;;  %v613_v31 = vsel %vm291_vm0, %v2537_v13, 0.0  ;;  %v599_v20 = vrot.slane %v598_v33, 2  ;;  %v584_v35 = vadd.f32 %v583_v15, %v582_v2 }
 0x193   : > { %v614_v48 = vadd.f32 %v613_v31, %v612_v17  ;;  %v607_v40 = vadd.f32 %v606_v26, %v605_v9  ;;  %v593_v24 = vadd.f32 %v592_v55, %v591_v22  ;;  %v622_v51 = vpack.c.bf16 %v566_v34, %v566_v34  ;;  %v1828_v55 = vld [vmem:[%s2947_s5 + $0x10] sm:$0xff]  }
 0x194   : > { %v600_v42 = vadd.f32 %v599_v20, %v598_v33  ;;  %v623_v56 = vpack.c.bf16 %v575_v38, %v575_v38  ;;  %v621_v47 = vpack.c.bf16 %v557_v41, %v557_v41  ;;  %v624_v1 = vpack.c.bf16 %v584_v35, %v584_v35  ;;  %v1826_v20 = vld [vmem:[%s2947_s5] sm:$0xff]   ;;  %v1829_v38 = vld [vmem:[%s2947_s5 + $0x18] sm:$0xff]   ;;  %v1831_v41 = vld [vmem:[%s2947_s5 + $0x28] sm:$0xff]  }
 0x195   : > { %v615_v43 = vrot.slane %v614_v48, 4  ;;  %v608_v49 = vrot.slane %v607_v40, 2  ;;  %v625_v53 = vpack.c.bf16 %v593_v24, %v593_v24  ;;  %v642_v61 = vunpack.c.l.b16 %v622_v51  ;;  %1721 = vmatprep.subr.bf16.mxu0 %v1826_v20  ;;  %1753 = vmatprep.subr.bf16.mxu1 %v1826_v20  ;;  %v1832_v35 = vld [vmem:[%s2947_s5 + $0x30] sm:$0xff]   ;;  %v2575_v51 = vld [vmem:[%s2944_s2] ss:$0 sm:$0xff] }
 0x196   : > { %1718 = vmatmul.mubr.msk.bf16.gmra.mrb[12].mxu1 %vm291_vm0, %v548_v30  ;;  %v601_v28 = vrot.slane %v600_v42, 1  ;;  %v643_v44 = vunpack.c.l.b16 %v623_v56  ;;  %v641_v2 = vunpack.c.l.b16 %v621_v47  ;;  %v644_v4 = vunpack.c.l.b16 %v624_v1 }
 0x197   : > { %v616_v36 = vadd.f32 %v615_v43, %v614_v48  ;;  %v609_v29 = vadd.f32 %v608_v49, %v607_v40  ;;  %v645_v6 = vunpack.c.l.b16 %v625_v53  ;;  %1761 = vmatpush3.bf16.msra.mxu1 %v1826_v20  ;;  %v1827_v48 = vld [vmem:[%s2947_s5 + $0x8] sm:$0xff]   ;;  %v1830_v40 = vld [vmem:[%s2947_s5 + $0x20] sm:$0xff]  }
 0x198   : > { %v602_v50 = vadd.f32 %v601_v28, %v600_v42  ;;  %v650_v45 = vsel %vm649_vm2, %v642_v61, %v641_v2  ;;  %1754 = vmatprep.subr.bf16.mxu1 %v1827_v48  ;;  %v1833_v42 = vld [vmem:[%s2947_s5 + $0x38] sm:$0xff]  }
 0x199   : > { %v617_v57 = vrot.slane %v616_v36, 2  ;;  %v610_v58 = vrot.slane %v609_v29, 1  ;;  %v652_v14 = vsel %vm651_vm3, %v643_v44, %v650_v45 }
 0x19a   : > { %v626_v62 = vpack.c.bf16 %v602_v50, %v602_v50  ;;  %v654_v22 = vsel %vm653_vm4, %v644_v4, %v652_v14 }
 0x19b   : > { %v618_v46 = vadd.f32 %v617_v57, %v616_v36  ;;  %v611_v25 = vadd.f32 %v610_v58, %v609_v29  ;;  %v656_v33 = vsel %vm655_vm5, %v645_v6, %v654_v22  ;;  %1762 = vmatpush3.bf16.msra.mxu1 %v1827_v48 }
 0x19c   : > { %v646_v23 = vunpack.c.l.b16 %v626_v62  ;;  %1755 = vmatprep.subr.bf16.mxu1 %v1828_v55 }
 0x19d   : > { %v619_v3 = vrot.slane %v618_v46, 1  ;;  %v627_v5 = vpack.c.bf16 %v611_v25, %v611_v25 }
 0x19e   : > { %v658_v30 = vsel %vm657_vm6, %v646_v23, %v656_v33 }
 0x19f   : > { %v620_v11 = vadd.f32 %v619_v3, %v618_v46  ;;  %v647_v9 = vunpack.c.l.b16 %v627_v5  ;;  %1763 = vmatpush3.bf16.msra.mxu1 %v1828_v55 }
 0x1a0   : > { %1756 = vmatprep.subr.bf16.mxu1 %v1829_v38 }
 0x1a1   : > { %v628_v15 = vpack.c.bf16 %v620_v11, %v620_v11  ;;  %v660_v17 = vsel %vm659_vm7, %v647_v9, %v658_v30 }
 0x1a3   : > { %v648_v26 = vunpack.c.l.b16 %v628_v15  ;;  %1764 = vmatpush3.bf16.msra.mxu1 %v1829_v38 }
 0x1a4   : > { %1757 = vmatprep.subr.bf16.mxu1 %v1830_v40 }
 0x1a5   : > { %v662_v31 = vsel %vm661_vm8, %v648_v26, %v660_v17 }
 0x1a6   : > { %v663_v34 = vpack.c.b16 %v662_v31, %v662_v31 }
 0x1a7   : > { %1765 = vmatpush3.bf16.msra.mxu1 %v1830_v40 }
 0x1a8   : > { %1698 = vmatmul.mubr.msk.bf16.vlgmr.msra.gmra.mrb[0].mxu0 %vm291_vm0, %v663_v34  ;;  %1758 = vmatprep.subr.bf16.mxu1 %v1831_v41 }
 0x1a9   : > { %1722 = vmatpush3.bf16.msra.mxu0 %v1826_v20 }
 0x1aa   : > { %1723 = vmatprep.subr.bf16.mxu0 %v1827_v48 }
 0x1ab   : > { %1766 = vmatpush3.bf16.msra.mxu1 %v1831_v41 }
 0x1ac   : > { %1759 = vmatprep.subr.bf16.mxu1 %v1832_v35 }
 0x1ad   : > { %1724 = vmatpush3.bf16.msra.mxu0 %v1827_v48 }
 0x1ae   : > { %1725 = vmatprep.subr.bf16.mxu0 %v1828_v55 }
 0x1af   : > { %1767 = vmatpush3.bf16.msra.mxu1 %v1832_v35 }
 0x1b0   : > { %1760 = vmatprep.subr.bf16.mxu1 %v1833_v42 }
 0x1b1   : > { %1726 = vmatpush3.bf16.msra.mxu0 %v1828_v55 }
 0x1b2   : > { %1727 = vmatprep.subr.bf16.mxu0 %v1829_v38 }
 0x1b3   : > { %1768 = vmatpush3.bf16.msra.mxu1 %v1833_v42 }
 0x1b5   : > { %1728 = vmatpush3.bf16.msra.mxu0 %v1829_v38 }
 0x1b6   : > { %1729 = vmatprep.subr.bf16.mxu0 %v1830_v40 }
 0x1b9   : > { %1730 = vmatpush3.bf16.msra.mxu0 %v1830_v40 }
 0x1ba   : > { %1731 = vmatprep.subr.bf16.mxu0 %v1831_v41 }
 0x1bd   : > { %1732 = vmatpush3.bf16.msra.mxu0 %v1831_v41 }
 0x1be   : > { %1733 = vmatprep.subr.bf16.mxu0 %v1832_v35 }
 0x1c1   : > { %1734 = vmatpush3.bf16.msra.mxu0 %v1832_v35 }
 0x1c2   : > { %1735 = vmatprep.subr.bf16.mxu0 %v1833_v42 }
 0x1c5   : > { %1736 = vmatpush3.bf16.msra.mxu0 %v1833_v42 }
 0x250   : > { %v1707_v43 = vpop.f32.mrb[0].mxu1 }
 0x251   : > { %v800_v24 = vpop.f32.mrb[1].mxu1  ;;  %v809_v36 = vadd.f32 %v1707_v43, %v2575_v51 }
 0x252   : > { %v1708_v49 = vpop.f32.mrb[2].mxu1  ;;  %v801_v56 = vadd.f32 %v2575_v51, %v800_v24 }
 0x253   : > { %v803_v28 = vpop.f32.mrb[3].mxu1  ;;  %v1632_v29 = vmul.f32 -1.442695, %v809_v36  ;;  %v812_v47 = vadd.f32 %v1708_v49, %v2575_v51 }
 0x254   : > { %v804_v57 = vadd.f32 %v2575_v51, %v803_v28  ;;  %v1630_v61 = vmul.f32 -1.442695, %v801_v56 }
 0x255   : > { %1866 = vpow2.f32 %v1632_v29  ;;  %v1633_v25 = vmul.f32 -1.442695, %v812_v47 }
 0x256   : > { %v1631_v2 = vmul.f32 -1.442695, %v804_v57  ;;  %1868 = vpow2.f32 %v1630_v61 }
 0x257   : > { %1870 = vpow2.f32 %v1633_v25 }
 0x258   : > { %1872 = vpow2.f32 %v1631_v2 }
 0x259   : > { %v1711_v50 = vpop.f32.mrb[4].mxu1 }
 0x25a   : > { %v816_v1 = vpop.f32.mrb[5].mxu1  ;;  %v825_v58 = vadd.f32 %v1711_v50, %v2575_v51 }
 0x25b   : > { %v1712_v53 = vpop.f32.mrb[6].mxu1  ;;  %v817_v46 = vadd.f32 %v2575_v51, %v816_v1 }
 0x25c   : > { %v819_v62 = vpop.f32.mrb[7].mxu1  ;;  %v1636_v3 = vmul.f32 -1.442695, %v825_v58  ;;  %v828_v14 = vadd.f32 %v1712_v53, %v2575_v51 }
 0x25d   : > { %v820_v44 = vadd.f32 %v2575_v51, %v819_v62  ;;  %v1634_v4 = vmul.f32 -1.442695, %v817_v46  ;;  %v2066_v62 = vmov 1966171168  }
 0x25e   : > { %1874 = vpow2.f32 %v1636_v3  ;;  %v1637_v20 = vmul.f32 -1.442695, %v828_v14  ;;  %v962_v25 = vunpack.c.l.s4 %v2066_v62 }
 0x25f   : > { %v1635_v5 = vmul.f32 -1.442695, %v820_v44  ;;  %1876 = vpow2.f32 %v1634_v4  ;;  %v1867_v17 = vpop.eup %1866 }
 0x260   : > { %v913_v48 = vadd.f32 1.0, %v1867_v17  ;;  %v1869_v38 = vpop.eup %1868 }
 0x261   : > { %v1715_v6 = vpop.f32.mrb[8].mxu1  ;;  %1878 = vpow2.f32 %v1635_v5  ;;  %v1871_v35 = vpop.eup %1870  ;;  %v911_v56 = vadd.f32 1.0, %v1869_v38 }
 0x262   : > { %v841_v11 = vadd.f32 %v1715_v6, %v2575_v51  ;;  %v832_v23 = vpop.f32.mrb[9].mxu1  ;;  %v1873_v24 = vpop.eup %1872  ;;  %v914_v57 = vadd.f32 1.0, %v1871_v35 }
 0x263   : > { %v833_v45 = vadd.f32 %v2575_v51, %v832_v23  ;;  %v1716_v9 = vpop.f32.mrb[10].mxu1  ;;  %v912_v53 = vadd.f32 1.0, %v1873_v24 }
 0x264   : > { %v1640_v15 = vmul.f32 -1.442695, %v841_v11  ;;  %v844_v22 = vadd.f32 %v1716_v9, %v2575_v51  ;;  %v835_v33 = vpop.f32.mrb[11].mxu1 }
 0x265   : > { %v1638_v26 = vmul.f32 -1.442695, %v833_v45  ;;  %v836_v30 = vadd.f32 %v2575_v51, %v835_v33  ;;  %v963_v45 = vunpack.c.0.s8 %v962_v25 }
 0x266   : > { %v1641_v31 = vmul.f32 -1.442695, %v844_v22  ;;  %1880 = vpow2.f32 %v1640_v15 }
 0x267   : > { %v1639_v34 = vmul.f32 -1.442695, %v836_v30  ;;  %1882 = vpow2.f32 %v1638_v26  ;;  %v966_v26 = vsub.s32 %v963_v45, %v2393_v7 }
 0x268   : > { %v1875_v29 = vpop.eup %1874 }
 0x269   : > { %1884 = vpow2.f32 %v1639_v34  ;;  %v1719_v55 = vpop.f32.mrb[12].mxu1  ;;  %v1877_v50 = vpop.eup %1876  ;;  %v917_v46 = vadd.f32 1.0, %v1875_v29 }
 0x26a   : > { %1886 = vpow2.f32 %v1641_v31  ;;  %v857_v40 = vadd.f32 %v1719_v55, %v2575_v51  ;;  %v848_v41 = vpop.f32.mrb[13].mxu1  ;;  %v915_v2 = vadd.f32 1.0, %v1877_v50 }
 0x26b   : > { %v849_v42 = vadd.f32 %v2575_v51, %v848_v41  ;;  %v1720_v43 = vpop.f32.mrb[14].mxu1  ;;  %1888 = vpow2.f32 %v1637_v20  ;;  %v1879_v58 = vpop.eup %1878 }
 0x26c   : > { %v1644_v49 = vmul.f32 -1.442695, %v857_v40  ;;  %v860_v28 = vadd.f32 %v1720_v43, %v2575_v51  ;;  %v851_v36 = vpop.f32.mrb[15].mxu1  ;;  %1890 = vrcp.f32 %v913_v48  ;;  %v916_v4 = vadd.f32 1.0, %v1879_v58 }
 0x26d   : > { %v1642_v47 = vmul.f32 -1.442695, %v849_v42  ;;  %v852_v61 = vadd.f32 %v2575_v51, %v851_v36 }
 0x26e   : > { %1892 = vpow2.f32 %v1644_v49  ;;  %v1645_v1 = vmul.f32 -1.442695, %v860_v28 }
 0x26f   : > { %1894 = vpow2.f32 %v1642_v47  ;;  %v1643_v6 = vmul.f32 -1.442695, %v852_v61 }
 0x270   : > { %1896 = vpow2.f32 %v1645_v1  ;;  %v1881_v44 = vpop.eup %1880 }
 0x271   : > { %1898 = vrcp.f32 %v911_v56  ;;  %v1883_v3 = vpop.eup %1882  ;;  %v921_v23 = vadd.f32 1.0, %v1881_v44 }
 0x272   : > { %1900 = vrcp.f32 %v914_v57  ;;  %v919_v9 = vadd.f32 1.0, %v1883_v3 }
 0x273   : > { %v1885_v5 = vpop.eup %1884  ;;  %1902 = vrcp.f32 %v912_v53 }
 0x274   : > { %v1887_v11 = vpop.eup %1886  ;;  %1904 = vrcp.f32 %v917_v46  ;;  %v920_v14 = vadd.f32 1.0, %v1885_v5 }
 0x275   : > { %1906 = vrcp.f32 %v915_v2  ;;  %v1889_v51 = vpop.eup %1888  ;;  %v922_v22 = vadd.f32 1.0, %v1887_v11 }
 0x276   : > { %1908 = vrcp.f32 %v916_v4  ;;  %v1891_v15 = vpop.eup %1890  ;;  %v918_v17 = vadd.f32 1.0, %v1889_v51 }
 0x277   : > { %1910 = vpow2.f32 %v1643_v6 }
 0x278   : > { %v1893_v33 = vpop.eup %1892  ;;  %1912 = vrcp.f32 %v921_v23 }
 0x279   : > { %v1895_v30 = vpop.eup %1894  ;;  %1914 = vrcp.f32 %v919_v9  ;;  %v925_v34 = vadd.f32 1.0, %v1893_v33 }
 0x27a   : > { %v1897_v31 = vpop.eup %1896  ;;  %1916 = vrcp.f32 %v920_v14  ;;  %v923_v20 = vadd.f32 1.0, %v1895_v30 }
 0x27b   : > { %v1899_v48 = vpop.eup %1898  ;;  %1918 = vrcp.f32 %v922_v22  ;;  %v926_v55 = vadd.f32 1.0, %v1897_v31  ;;  %v713_v38 = vpop.f32.mrb[0].mxu0 }
 0x27c   : > { %v1901_v40 = vpop.eup %1900  ;;  %1920 = vrcp.f32 %v923_v20  ;;  %v960_v41 = vcombine.high %v713_v38, %v713_v38  ;;  %v967_v35 = vrot.slane %v713_v38, %v966_v26  ;;  %v1699_v42 = vpop.f32.mrb[1].mxu0 }
 0x27d   : > { %v1903_v43 = vpop.eup %1902  ;;  %1922 = vrcp.f32 %v918_v17  ;;  %v716_v24 = vpop.f32.mrb[2].mxu0 }
 0x27e   : > { %v1905_v49 = vpop.eup %1904  ;;  %1924 = vrcp.f32 %v925_v34  ;;  %v974_v28 = vrot.slane %v960_v41, %v966_v26  ;;  %v975_v36 = vcombine.high %v967_v35, %v967_v35  ;;  %v983_v29 = vrot.slane %v967_v35, %v966_v26  ;;  %v1700_v56 = vpop.f32.mrb[3].mxu0 }
 0x27f   : > { %v1907_v47 = vpop.eup %1906  ;;  %1926 = vrcp.f32 %v926_v55 }
 0x280   : > { %v1909_v50 = vpop.eup %1908  ;;  %v976_v57 = vcombine.high %v974_v28, %v974_v28  ;;  %v990_v1 = vrot.slane %v974_v28, %v966_v26  ;;  %v997_v58 = vrot.slane %v975_v36, %v966_v26  ;;  %v1005_v53 = vcombine.high %v983_v29, %v983_v29 }
 0x281   : > { %v1911_v61 = vpop.eup %1910  ;;  %v1012_v46 = vrot.slane %v983_v29, %v2396_v18 }
 0x282   : > { %v1913_v62 = vpop.eup %1912  ;;  %v924_v25 = vadd.f32 1.0, %v1911_v61  ;;  %v1004_v44 = vrot.slane %v976_v57, %v966_v26  ;;  %v1006_v2 = vcombine.high %v990_v1, %v990_v1  ;;  %v1007_v3 = vcombine.high %v997_v58, %v997_v58 }
 0x283   : > { %v1915_v4 = vpop.eup %1914  ;;  %v1016_v5 = vrot.slane %v997_v58, %v2396_v18  ;;  %v1020_v6 = vrot.slane %v1005_v53, %v2396_v18  ;;  %v1028_v11 = vrot.slane %v990_v1, %v2396_v18  ;;  %v1049_v23 = vmul.f32 %v1899_v48, %v1012_v46 }
 0x284   : > { %v1917_v45 = vpop.eup %1916  ;;  %1928 = vrcp.f32 %v924_v25  ;;  %v1008_v9 = vcombine.high %v1004_v44, %v1004_v44  ;;  %v1032_v51 = vrot.slane %v1004_v44, %v2396_v18  ;;  %v1050_v14 = vmul.f32 %v1903_v43, %v1012_v46 }
 0x285   : > { %v1919_v22 = vpop.eup %1918  ;;  %v1051_v33 = vmul.f32 %v1891_v15, %v1016_v5  ;;  %v1052_v30 = vmul.f32 %v1901_v40, %v1016_v5  ;;  %v1057_v26 = vmul.f32 %v1915_v4, %v1028_v11  ;;  %v1058_v17 = vmul.f32 %v1917_v45, %v1028_v11 }
 0x286   : > { %v1921_v31 = vpop.eup %1920  ;;  %v1059_v34 = vmul.f32 %v1913_v62, %v1032_v51  ;;  %v1060_v20 = vmul.f32 %v1919_v22, %v1032_v51  ;;  %v1065_v55 = vpack.c.bf16 %v1050_v14, %v1049_v23  ;;  %v1053_v38 = vmul.f32 %v1907_v47, %v1020_v6 }
 0x287   : > { %v1923_v41 = vpop.eup %1922  ;;  %v1066_v35 = vpack.c.bf16 %v1052_v30, %v1051_v33  ;;  %v1069_v42 = vpack.c.bf16 %v1058_v17, %v1057_v26  ;;  %v1054_v48 = vmul.f32 %v1909_v50, %v1020_v6  ;;  %v1036_v24 = vrot.slane %v1006_v2, %v2396_v18 }
 0x288   : > { %v1925_v28 = vpop.eup %1924  ;;  %1737 = vmatprep.mubr.bf16.mxu0 %v1065_v55  ;;  %v1070_v36 = vpack.c.bf16 %v1060_v20, %v1059_v34  ;;  %v1024_v43 = vrot.slane %v1007_v3, %v2396_v18  ;;  %v1040_v15 = vrot.slane %v1008_v9, %v2396_v18  ;;  %v1091_v18 = vsub.s32 4, %v2393_v7 }
 0x289   : > { %v1927_v40 = vpop.eup %1926  ;;  %1738 = vmatmul.mubr.bf16.vlgmr.msra.gmra.mrb[4].mxu0 %v1066_v35  ;;  %1745 = vmatprep.mubr.bf16.mxu1 %v1069_v42  ;;  %v1067_v29 = vpack.c.bf16 %v1054_v48, %v1053_v38  ;;  %v1061_v56 = vmul.f32 %v1921_v31, %v1036_v24 }
 0x28a   : > { %1746 = vmatmul.mubr.bf16.vlgmr.msra.gmra.mrb[16].mxu1 %v1070_v36  ;;  %v1055_v47 = vmul.f32 %v1905_v49, %v1024_v43  ;;  %v1056_v57 = vmul.f32 %v1923_v41, %v1024_v43  ;;  %v1063_v1 = vmul.f32 %v1925_v28, %v1040_v15  ;;  %v1064_v58 = vmul.f32 %v1927_v40, %v1040_v15 }
 0x28b   : > { %1741 = vmatprep.mubr.bf16.mxu0 %v1067_v29  ;;  %v2604_v25 = vrot.slane %v2401_v16, %v1091_v18 }
 0x28c   : > { %v1068_v50 = vpack.c.bf16 %v1056_v57, %v1055_v47  ;;  %v1072_v53 = vpack.c.bf16 %v1064_v58, %v1063_v1 }
 0x28e   : > { %v1929_v61 = vpop.eup %1928 }
 0x28f   : > { %v1062_v46 = vmul.f32 %v1929_v61, %v1036_v24 }
 0x291   : > { %v1071_v62 = vpack.c.bf16 %v1062_v46, %v1061_v56  ;;  %1742 = vmatmul.mubr.bf16.gmra.mrb[8].mxu0 %v1068_v50 }
 0x293   : > { %1749 = vmatprep.mubr.bf16.mxu1 %v1071_v62 }
 0x294   : > { %1750 = vmatmul.mubr.bf16.gmra.mrb[20].mxu1 %v1072_v53 }
 0x35c   : > { %v1739_v44 = vpop.f32.mrb[4].mxu0 }
 0x35d   : > { %v1184_v49 = vadd.f32 %v1739_v44, %v2604_v25  ;;  %v1175_v2 = vpop.f32.mrb[5].mxu0  ;;  %v1747_v3 = vpop.f32.mrb[16].mxu1 }
 0x35e   : > { %v1176_v4 = vadd.f32 %v1175_v2, %v2604_v25  ;;  %v1740_v5 = vpop.f32.mrb[6].mxu0  ;;  %v1207_v6 = vpop.f32.mrb[17].mxu1  ;;  %v1216_v48 = vadd.f32 %v1747_v3, %v2604_v25 }
 0x35f   : > { %v1187_v11 = vadd.f32 %v1740_v5, %v2604_v25  ;;  %v1178_v23 = vpop.f32.mrb[7].mxu0  ;;  %v1748_v45 = vpop.f32.mrb[18].mxu1  ;;  %v2610_v9 = vadd.f32 %v1184_v49, %v2433_v54  ;;  %v1208_v56 = vadd.f32 %v1207_v6, %v2604_v25 }
 0x360   : > { %v1179_v51 = vadd.f32 %v1178_v23, %v2604_v25  ;;  %v1210_v16 = vpop.f32.mrb[19].mxu1  ;;  %v2619_v33 = vadd.f32 %v1176_v4, %v2417_v59  ;;  %v2656_v47 = vadd.f32 %v1216_v48, %v2496_v39 }
 0x361   : > { %v1260_v14 = vsel %vm291_vm0, %v2610_v9, 0.0  ;;  %v2616_v22 = vadd.f32 %v1187_v11, %v2438_v27  ;;  %v2668_v50 = vadd.f32 %v1208_v56, %v2486_v19 }
 0x362   : > { %1261 = vadd.xlane.f32.xlu0 %v1260_v14  ;;  %v2624_v26 = vadd.f32 %v1179_v51, %v2422_v37  ;;  %v1254_v34 = vsel %vm291_vm0, %v2619_v33, 0.0  ;;  %v1284_v58 = vsel %vm291_vm0, %v2656_v47, 0.0 }
 0x363   : > { %v1263_v30 = vsel %vm291_vm0, %v2616_v22, 0.0  ;;  %v1278_v46 = vsel %vm291_vm0, %v2668_v50, 0.0 }
 0x364   : > { %1264 = vadd.xlane.f32.xlu1 %v1263_v30  ;;  %v1743_v54 = vpop.f32.mrb[8].mxu0  ;;  %v1257_v37 = vsel %vm291_vm0, %v2624_v26, 0.0 }
 0x365   : > { %v1200_v17 = vadd.f32 %v1743_v54, %v2604_v25  ;;  %v1191_v31 = vpop.f32.mrb[9].mxu0 }
 0x366   : > { %v1192_v27 = vadd.f32 %v1191_v31, %v2604_v25  ;;  %v1744_v20 = vpop.f32.mrb[10].mxu0  ;;  %1255 = vadd.xlane.f32.xlu0 %v1254_v34 }
 0x367   : > { %v1203_v59 = vadd.f32 %v1744_v20, %v2604_v25  ;;  %v1751_v55 = vpop.f32.mrb[20].mxu1  ;;  %v1194_v38 = vpop.f32.mrb[11].mxu0  ;;  %v2634_v41 = vadd.f32 %v1200_v17, %v2470_v63  ;;  %v1219_v63 = vadd.f32 %v1748_v45, %v2604_v25 }
 0x368   : > { %v1195_v35 = vadd.f32 %v1194_v38, %v2604_v25  ;;  %v1223_v42 = vpop.f32.mrb[21].mxu1  ;;  %1258 = vadd.xlane.f32.xlu1 %v1257_v37  ;;  %v2644_v43 = vadd.f32 %v1192_v27, %v2451_v0  ;;  %v1211_v0 = vadd.f32 %v1210_v16, %v2604_v25 }
 0x369   : > { %v1752_v24 = vpop.f32.mrb[22].mxu1  ;;  %v1272_v28 = vsel %vm291_vm0, %v2634_v41, 0.0  ;;  %v2641_v36 = vadd.f32 %v1203_v59, %v2474_v8  ;;  %v2662_v1 = vadd.f32 %v1219_v63, %v2506_v21  ;;  %v1232_v21 = vadd.f32 %v1751_v55, %v2604_v25 }
 0x36a   : > { %v1226_v15 = vpop.f32.mrb[23].mxu1  ;;  %1273 = vadd.xlane.f32.xlu0 %v1272_v28  ;;  %v2650_v29 = vadd.f32 %v1195_v35, %v2455_v52  ;;  %v1266_v8 = vsel %vm291_vm0, %v2644_v43, 0.0  ;;  %v1224_v52 = vadd.f32 %v1223_v42, %v2604_v25  ;;  %v2674_v61 = vadd.f32 %v1211_v0, %v2491_v32 }
 0x36b   : > { %v1275_v40 = vsel %vm291_vm0, %v2641_v36, 0.0  ;;  %v1227_v39 = vadd.f32 %v1226_v15, %v2604_v25  ;;  %v1287_v53 = vsel %vm291_vm0, %v2662_v1, 0.0  ;;  %v1235_v19 = vadd.f32 %v1752_v24, %v2604_v25 }
 0x36c   : > { %1276 = vadd.xlane.f32.xlu1 %v1275_v40  ;;  %v1269_v57 = vsel %vm291_vm0, %v2650_v29, 0.0  ;;  %v2680_v62 = vadd.f32 %v1224_v52, %v2519_v60  ;;  %v1281_v18 = vsel %vm291_vm0, %v2674_v61, 0.0  ;;  %v2691_v49 = vadd.f32 %v1232_v21, %v2534_v12 }
 0x36d   : > { %v2686_v44 = vadd.f32 %v1227_v39, %v2522_v10  ;;  %v2696_v2 = vadd.f32 %v1235_v19, %v2537_v13 }
 0x36e   : > { %1267 = vadd.xlane.f32.xlu0 %v1266_v8  ;;  %v1290_v32 = vsel %vm291_vm0, %v2680_v62, 0.0  ;;  %v1296_v25 = vsel %vm291_vm0, %v2691_v49, 0.0 }
 0x36f   : > { %v1293_v60 = vsel %vm291_vm0, %v2686_v44, 0.0  ;;  %v1299_v10 = vsel %vm291_vm0, %v2696_v2, 0.0 }
 0x370   : > { %1270 = vadd.xlane.f32.xlu1 %v1269_v57 }
 0x372   : > { %1285 = vadd.xlane.f32.xlu0 %v1284_v58 }
 0x374   : > { %1288 = vadd.xlane.f32.xlu1 %v1287_v53 }
 0x376   : > { %1279 = vadd.xlane.f32.xlu0 %v1278_v46 }
 0x378   : > { %1282 = vadd.xlane.f32.xlu1 %v1281_v18 }
 0x37a   : > { %1291 = vadd.xlane.f32.xlu0 %v1290_v32 }
 0x37c   : > { %1294 = vadd.xlane.f32.xlu1 %v1293_v60 }
 0x37e   : > { %1297 = vadd.xlane.f32.xlu0 %v1296_v25 }
 0x380   : > { %1300 = vadd.xlane.f32.xlu1 %v1299_v10 }
 0x3ef   : > { %v1262_v3 = vpop.xlane.xlu0 %1261 }
 0x3f0   : > { %v1304_v4 = vmul.f32 0.03125, %v1262_v3 }
 0x3f1   : > { %v1265_v12 = vpop.xlane.xlu1 %1264 }
 0x3f2   : > { %v2703_v5 = vsub.f32 %v2610_v9, %v1304_v4  ;;  %v1305_v6 = vmul.f32 0.03125, %v1265_v12 }
 0x3f3   : > { %v1256_v11 = vpop.xlane.xlu0 %1255 }
 0x3f4   : > { %v2706_v13 = vsub.f32 %v2616_v22, %v1305_v6  ;;  %v1302_v23 = vmul.f32 0.03125, %v1256_v11  ;;  %v1336_v45 = vmul.f32 %v2703_v5, %v2703_v5 }
 0x3f5   : > { %v1259_v51 = vpop.xlane.xlu1 %1258 }
 0x3f6   : > { %v2711_v16 = vsub.f32 %v2619_v33, %v1302_v23  ;;  %v1303_v14 = vmul.f32 0.03125, %v1259_v51  ;;  %v1356_v30 = vsel %vm291_vm0, %v1336_v45, 0.0  ;;  %v1337_v9 = vmul.f32 %v2706_v13, %v2706_v13 }
 0x3f7   : > { %1357 = vadd.xlane.f32.xlu0 %v1356_v30  ;;  %v1274_v54 = vpop.xlane.xlu0 %1273 }
 0x3f8   : > { %v2717_v17 = vsub.f32 %v2624_v26, %v1303_v14  ;;  %v1308_v22 = vmul.f32 0.03125, %v1274_v54  ;;  %v1359_v31 = vsel %vm291_vm0, %v1337_v9, 0.0  ;;  %v1334_v34 = vmul.f32 %v2711_v16, %v2711_v16 }
 0x3f9   : > { %1360 = vadd.xlane.f32.xlu1 %v1359_v31  ;;  %v1277_v33 = vpop.xlane.xlu1 %1276 }
 0x3fa   : > { %v2723_v27 = vsub.f32 %v2634_v41, %v1308_v22  ;;  %v1309_v20 = vmul.f32 0.03125, %v1277_v33  ;;  %v1350_v59 = vsel %vm291_vm0, %v1334_v34, 0.0  ;;  %v1335_v55 = vmul.f32 %v2717_v17, %v2717_v17 }
 0x3fb   : > { %1351 = vadd.xlane.f32.xlu0 %v1350_v59  ;;  %v1268_v26 = vpop.xlane.xlu0 %1267 }
 0x3fc   : > { %v2729_v38 = vsub.f32 %v2641_v36, %v1309_v20  ;;  %v1306_v37 = vmul.f32 0.03125, %v1268_v26  ;;  %v1353_v35 = vsel %vm291_vm0, %v1335_v55, 0.0  ;;  %v1340_v42 = vmul.f32 %v2723_v27, %v2723_v27 }
 0x3fd   : > { %1354 = vadd.xlane.f32.xlu1 %v1353_v35  ;;  %v1271_v41 = vpop.xlane.xlu1 %1270 }
 0x3fe   : > { %v2735_v48 = vsub.f32 %v2644_v43, %v1306_v37  ;;  %v1307_v24 = vmul.f32 0.03125, %v1271_v41  ;;  %v1368_v28 = vsel %vm291_vm0, %v1340_v42, 0.0  ;;  %v1341_v15 = vmul.f32 %v2729_v38, %v2729_v38 }
 0x3ff   : > { %1369 = vadd.xlane.f32.xlu0 %v1368_v28  ;;  %v1286_v36 = vpop.xlane.xlu0 %1285 }
 0x400   : > { %v2741_v63 = vsub.f32 %v2650_v29, %v1307_v24  ;;  %v1312_v40 = vmul.f32 0.03125, %v1286_v36  ;;  %v1371_v56 = vsel %vm291_vm0, %v1341_v15, 0.0  ;;  %v1338_v8 = vmul.f32 %v2735_v48, %v2735_v48 }
 0x401   : > { %1372 = vadd.xlane.f32.xlu1 %v1371_v56  ;;  %v1289_v43 = vpop.xlane.xlu1 %1288 }
 0x402   : > { %v2747_v0 = vsub.f32 %v2656_v47, %v1312_v40  ;;  %v1313_v57 = vmul.f32 0.03125, %v1289_v43  ;;  %v1362_v52 = vsel %vm291_vm0, %v1338_v8, 0.0  ;;  %v1339_v58 = vmul.f32 %v2741_v63, %v2741_v63 }
 0x403   : > { %1363 = vadd.xlane.f32.xlu0 %v1362_v52  ;;  %v1280_v29 = vpop.xlane.xlu0 %1279  ;;  %v1464_v43 = vsub.s32 2, %v2393_v7 }
 0x404   : > { %v2753_v39 = vsub.f32 %v2662_v1, %v1313_v57  ;;  %v1310_v53 = vmul.f32 0.03125, %v1280_v29  ;;  %v1365_v21 = vsel %vm291_vm0, %v1339_v58, 0.0  ;;  %v1344_v46 = vmul.f32 %v2747_v0, %v2747_v0 }
 0x405   : > { %1366 = vadd.xlane.f32.xlu1 %v1365_v21  ;;  %v1283_v47 = vpop.xlane.xlu1 %1282  ;;  %v1484_v29 = vsub.s32 3, %v2393_v7 }
 0x406   : > { %v2759_v19 = vsub.f32 %v2668_v50, %v1310_v53  ;;  %v1311_v18 = vmul.f32 0.03125, %v1283_v47  ;;  %v1380_v32 = vsel %vm291_vm0, %v1344_v46, 0.0  ;;  %v1345_v60 = vmul.f32 %v2753_v39, %v2753_v39  ;;  %v1962_v47 = vld [vmem:[%s2943_s1] sm:$0x1f] }
 0x407   : > { %1381 = vadd.xlane.f32.xlu0 %v1380_v32  ;;  %v1292_v1 = vpop.xlane.xlu0 %1291 }
 0x408   : > { %v2765_v25 = vsub.f32 %v2674_v61, %v1311_v18  ;;  %v1314_v10 = vmul.f32 0.03125, %v1292_v1  ;;  %v1383_v3 = vsel %vm291_vm0, %v1345_v60, 0.0  ;;  %v1342_v4 = vmul.f32 %v2759_v19, %v2759_v19 }
 0x409   : > { %1384 = vadd.xlane.f32.xlu1 %v1383_v3  ;;  %v1295_v50 = vpop.xlane.xlu1 %1294  ;;  %v2803_v18 = vrot.slane %v1962_v47, %v1464_v43  ;;  %v2805_v3 = vrot.slane %v1962_v47, %v1484_v29 }
 0x40a   : > { %v2771_v12 = vsub.f32 %v2680_v62, %v1314_v10  ;;  %v1315_v6 = vmul.f32 0.03125, %v1295_v50  ;;  %v1374_v11 = vsel %vm291_vm0, %v1342_v4, 0.0  ;;  %v1343_v23 = vmul.f32 %v2765_v25, %v2765_v25 }
 0x40b   : > { %1375 = vadd.xlane.f32.xlu0 %v1374_v11  ;;  %v1298_v61 = vpop.xlane.xlu0 %1297 }
 0x40c   : > { %v2777_v45 = vsub.f32 %v2686_v44, %v1315_v6  ;;  %v1316_v51 = vmul.f32 0.03125, %v1298_v61  ;;  %v1377_v14 = vsel %vm291_vm0, %v1343_v23, 0.0  ;;  %v1346_v30 = vmul.f32 %v2771_v12, %v2771_v12 }
 0x40d   : > { %1378 = vadd.xlane.f32.xlu1 %v1377_v14  ;;  %v1301_v62 = vpop.xlane.xlu1 %1300 }
 0x40e   : > { %v2783_v9 = vsub.f32 %v2691_v49, %v1316_v51  ;;  %v1317_v54 = vmul.f32 0.03125, %v1301_v62  ;;  %v1386_v22 = vsel %vm291_vm0, %v1346_v30, 0.0  ;;  %v1347_v31 = vmul.f32 %v2777_v45, %v2777_v45 }
 0x40f   : > { %1387 = vadd.xlane.f32.xlu0 %v1386_v22 }
 0x410   : > { %v2789_v44 = vsub.f32 %v2696_v2, %v1317_v54  ;;  %v1389_v34 = vsel %vm291_vm0, %v1347_v31, 0.0  ;;  %v1348_v33 = vmul.f32 %v2783_v9, %v2783_v9 }
 0x411   : > { %1390 = vadd.xlane.f32.xlu1 %v1389_v34 }
 0x412   : > { %v1392_v20 = vsel %vm291_vm0, %v1348_v33, 0.0  ;;  %v1349_v49 = vmul.f32 %v2789_v44, %v2789_v44 }
 0x413   : > { %1393 = vadd.xlane.f32.xlu0 %v1392_v20 }
 0x414   : > { %v1395_v59 = vsel %vm291_vm0, %v1349_v49, 0.0 }
 0x415   : > { %1396 = vadd.xlane.f32.xlu1 %v1395_v59 }
 0x484   : > { %v1358_v55 = vpop.xlane.xlu0 %1357 }
 0x485   : > { %v1400_v26 = vmul.f32 0.03125, %v1358_v55 }
 0x486   : > { %v1361_v37 = vpop.xlane.xlu1 %1360 }
 0x487   : > { %v1416_v2 = vadd.f32 1e-05, %v1400_v26  ;;  %v1401_v35 = vmul.f32 0.03125, %v1361_v37 }
 0x488   : > { %v1352_v42 = vpop.xlane.xlu0 %1351 }
 0x489   : > { %1930 = vrsqrt.f32 %v1416_v2  ;;  %v1417_v41 = vadd.f32 1e-05, %v1401_v35  ;;  %v1398_v24 = vmul.f32 0.03125, %v1352_v42 }
 0x48a   : > { %v1355_v28 = vpop.xlane.xlu1 %1354 }
 0x48b   : > { %1932 = vrsqrt.f32 %v1417_v41  ;;  %v1414_v15 = vadd.f32 1e-05, %v1398_v24  ;;  %v1399_v36 = vmul.f32 0.03125, %v1355_v28 }
 0x48c   : > { %v1370_v40 = vpop.xlane.xlu0 %1369 }
 0x48d   : > { %1934 = vrsqrt.f32 %v1414_v15  ;;  %v1415_v56 = vadd.f32 1e-05, %v1399_v36  ;;  %v1404_v8 = vmul.f32 0.03125, %v1370_v40 }
 0x48e   : > { %v1373_v57 = vpop.xlane.xlu1 %1372 }
 0x48f   : > { %1936 = vrsqrt.f32 %v1415_v56  ;;  %v1420_v52 = vadd.f32 1e-05, %v1404_v8  ;;  %v1405_v58 = vmul.f32 0.03125, %v1373_v57 }
 0x490   : > { %v1364_v53 = vpop.xlane.xlu0 %1363 }
 0x491   : > { %1938 = vrsqrt.f32 %v1420_v52  ;;  %v1421_v21 = vadd.f32 1e-05, %v1405_v58  ;;  %v1402_v46 = vmul.f32 0.03125, %v1364_v53 }
 0x492   : > { %v1367_v32 = vpop.xlane.xlu1 %1366 }
 0x493   : > { %v1931_v60 = vpop.eup %1930  ;;  %1940 = vrsqrt.f32 %v1421_v21  ;;  %v1418_v1 = vadd.f32 1e-05, %v1402_v46  ;;  %v1403_v10 = vmul.f32 0.03125, %v1367_v32 }
 0x494   : > { %v1448_v4 = vmul.f32 %v1931_v60, %v2703_v5  ;;  %v1382_v7 = vpop.xlane.xlu0 %1381 }
 0x495   : > { %v1933_v50 = vpop.eup %1932  ;;  %1942 = vrsqrt.f32 %v1418_v1  ;;  %v1419_v6 = vadd.f32 1e-05, %v1403_v10  ;;  %v1408_v11 = vmul.f32 0.03125, %v1382_v7 }
 0x496   : > { %v1468_v23 = vmul.f32 %v2803_v18, %v1448_v4  ;;  %v1449_v61 = vmul.f32 %v1933_v50, %v2706_v13  ;;  %v1385_v51 = vpop.xlane.xlu1 %1384 }
 0x497   : > { %v1935_v14 = vpop.eup %1934  ;;  %1944 = vrsqrt.f32 %v1419_v6  ;;  %v1424_v30 = vadd.f32 1e-05, %v1408_v11  ;;  %v1409_v62 = vmul.f32 0.03125, %v1385_v51 }
 0x498   : > { %v1488_v54 = vadd.f32 %v2805_v3, %v1468_v23  ;;  %v1469_v22 = vmul.f32 %v2803_v18, %v1449_v61  ;;  %v1446_v5 = vmul.f32 %v1935_v14, %v2711_v16  ;;  %v1376_v31 = vpop.xlane.xlu0 %1375 }
 0x499   : > { %v1937_v34 = vpop.eup %1936  ;;  %1946 = vrsqrt.f32 %v1424_v30  ;;  %v1425_v33 = vadd.f32 1e-05, %v1409_v62  ;;  %v1406_v20 = vmul.f32 0.03125, %v1376_v31 }
 0x49a   : > { %1504 = vst.msk [vmem:[%s2815_s20 + $0x10] sm:$0xff] %vm291_vm0, %v1488_v54  ;;  %v1489_v13 = vadd.f32 %v2805_v3, %v1469_v22  ;;  %v1466_v49 = vmul.f32 %v2803_v18, %v1446_v5  ;;  %v1447_v59 = vmul.f32 %v1937_v34, %v2717_v17  ;;  %v1379_v16 = vpop.xlane.xlu1 %1378 }
 0x49b   : > { %v1939_v55 = vpop.eup %1938  ;;  %1948 = vrsqrt.f32 %v1425_v33  ;;  %v1422_v26 = vadd.f32 1e-05, %v1406_v20  ;;  %v1407_v37 = vmul.f32 0.03125, %v1379_v16 }
 0x49c   : > { %1505 = vst.msk [vmem:[%s2815_s20 + $0x18] sm:$0xff] %vm291_vm0, %v1489_v13  ;;  %v1486_v2 = vadd.f32 %v2805_v3, %v1466_v49  ;;  %v1467_v35 = vmul.f32 %v2803_v18, %v1447_v59  ;;  %v1452_v42 = vmul.f32 %v1939_v55, %v2723_v27  ;;  %v1388_v41 = vpop.xlane.xlu0 %1387 }
 0x49d   : > { %v1941_v24 = vpop.eup %1940  ;;  %1950 = vrsqrt.f32 %v1422_v26  ;;  %v1423_v28 = vadd.f32 1e-05, %v1407_v37  ;;  %v1410_v15 = vmul.f32 0.03125, %v1388_v41 }
 0x49e   : > { %1502 = vst.msk [vmem:[%s2815_s20] sm:$0xff] %vm291_vm0, %v1486_v2  ;;  %v1487_v17 = vadd.f32 %v2805_v3, %v1467_v35  ;;  %v1472_v36 = vmul.f32 %v2803_v18, %v1452_v42  ;;  %v1453_v40 = vmul.f32 %v1941_v24, %v2729_v38  ;;  %v1391_v56 = vpop.xlane.xlu1 %1390 }
 0x49f   : > { %v1943_v8 = vpop.eup %1942  ;;  %1952 = vrsqrt.f32 %v1423_v28  ;;  %v1426_v43 = vadd.f32 1e-05, %v1410_v15  ;;  %v1411_v57 = vmul.f32 0.03125, %v1391_v56 }
 0x4a0   : > { %1503 = vst.msk [vmem:[%s2815_s20 + $0x8] sm:$0xff] %vm291_vm0, %v1487_v17  ;;  %v1492_v27 = vadd.f32 %v2805_v3, %v1472_v36  ;;  %v1473_v52 = vmul.f32 %v2803_v18, %v1453_v40  ;;  %v1450_v58 = vmul.f32 %v1943_v8, %v2735_v48  ;;  %v1394_v29 = vpop.xlane.xlu0 %1393 }
 0x4a1   : > { %v1945_v53 = vpop.eup %1944  ;;  %1954 = vrsqrt.f32 %v1426_v43  ;;  %v1427_v21 = vadd.f32 1e-05, %v1411_v57  ;;  %v1412_v46 = vmul.f32 0.03125, %v1394_v29 }
 0x4a2   : > { %1508 = vst.msk [vmem:[%s2815_s20 + $0x30] sm:$0xff] %vm291_vm0, %v1492_v27  ;;  %v1493_v38 = vadd.f32 %v2805_v3, %v1473_v52  ;;  %v1470_v47 = vmul.f32 %v2803_v18, %v1450_v58  ;;  %v1451_v32 = vmul.f32 %v1945_v53, %v2741_v63  ;;  %v1397_v60 = vpop.xlane.xlu1 %1396 }
 0x4a3   : > { %v1947_v1 = vpop.eup %1946  ;;  %1956 = vrsqrt.f32 %v1427_v21  ;;  %v1428_v10 = vadd.f32 1e-05, %v1412_v46  ;;  %v1413_v48 = vmul.f32 0.03125, %v1397_v60 }
 0x4a4   : > { %1509 = vst.msk [vmem:[%s2815_s20 + $0x38] sm:$0xff] %vm291_vm0, %v1493_v38  ;;  %v1490_v4 = vadd.f32 %v2805_v3, %v1470_v47  ;;  %v1471_v7 = vmul.f32 %v2803_v18, %v1451_v32  ;;  %v1456_v50 = vmul.f32 %v1947_v1, %v2747_v0 }
 0x4a5   : > { %v1949_v6 = vpop.eup %1948  ;;  %1958 = vrsqrt.f32 %v1428_v10  ;;  %v1429_v11 = vadd.f32 1e-05, %v1413_v48 }
 0x4a6   : > { %1506 = vst.msk [vmem:[%s2815_s20 + $0x20] sm:$0xff] %vm291_vm0, %v1490_v4  ;;  %v1491_v63 = vadd.f32 %v2805_v3, %v1471_v7  ;;  %v1476_v23 = vmul.f32 %v2803_v18, %v1456_v50  ;;  %v1457_v61 = vmul.f32 %v1949_v6, %v2753_v39 }
 0x4a7   : > { %v1951_v51 = vpop.eup %1950  ;;  %1960 = vrsqrt.f32 %v1429_v11 }
 0x4a8   : > { %1507 = vst.msk [vmem:[%s2815_s20 + $0x28] sm:$0xff] %vm291_vm0, %v1491_v63  ;;  %v1496_v14 = vadd.f32 %v2805_v3, %v1476_v23  ;;  %v1477_v0 = vmul.f32 %v2803_v18, %v1457_v61  ;;  %v1454_v30 = vmul.f32 %v1951_v51, %v2759_v19 }
 0x4a9   : > { %v1953_v62 = vpop.eup %1952 }
 0x4aa   : > { %1512 = vst.msk [vmem:[%s2815_s20 + $0x50] sm:$0xff] %vm291_vm0, %v1496_v14  ;;  %v1497_v54 = vadd.f32 %v2805_v3, %v1477_v0  ;;  %v1474_v22 = vmul.f32 %v2803_v18, %v1454_v30  ;;  %v1455_v39 = vmul.f32 %v1953_v62, %v2765_v25 }
 0x4ab   : > { %v1955_v5 = vpop.eup %1954 }
 0x4ac   : > { %1513 = vst.msk [vmem:[%s2815_s20 + $0x58] sm:$0xff] %vm291_vm0, %v1497_v54  ;;  %v1494_v31 = vadd.f32 %v2805_v3, %v1474_v22  ;;  %v1475_v34 = vmul.f32 %v2803_v18, %v1455_v39  ;;  %v1458_v19 = vmul.f32 %v1955_v5, %v2771_v12 }
 0x4ad   : > { %v1957_v33 = vpop.eup %1956 }
 0x4ae   : > { %1510 = vst.msk [vmem:[%s2815_s20 + $0x40] sm:$0xff] %vm291_vm0, %v1494_v31  ;;  %v1495_v20 = vadd.f32 %v2805_v3, %v1475_v34  ;;  %v1478_v25 = vmul.f32 %v2803_v18, %v1458_v19  ;;  %v1459_v13 = vmul.f32 %v1957_v33, %v2777_v45 }
 0x4af   : > { %v1959_v49 = vpop.eup %1958 }
 0x4b0   : > { %1511 = vst.msk [vmem:[%s2815_s20 + $0x48] sm:$0xff] %vm291_vm0, %v1495_v20  ;;  %v1498_v59 = vadd.f32 %v2805_v3, %v1478_v25  ;;  %v1479_v12 = vmul.f32 %v2803_v18, %v1459_v13  ;;  %v1460_v16 = vmul.f32 %v1959_v49, %v2783_v9 }
 0x4b1   : > { %v1961_v55 = vpop.eup %1960 }
 0x4b2   : > { %1514 = vst.msk [vmem:[%s2815_s20 + $0x60] sm:$0xff] %vm291_vm0, %v1498_v59  ;;  %v1499_v26 = vadd.f32 %v2805_v3, %v1479_v12  ;;  %v1480_v45 = vmul.f32 %v2803_v18, %v1460_v16  ;;  %v1461_v37 = vmul.f32 %v1961_v55, %v2789_v44 }
 0x4b4   : > { %1515 = vst.msk [vmem:[%s2815_s20 + $0x68] sm:$0xff] %vm291_vm0, %v1499_v26  ;;  %v1500_v2 = vadd.f32 %v2805_v3, %v1480_v45  ;;  %v1481_v35 = vmul.f32 %v2803_v18, %v1461_v37 }
 0x4b6   : > { %1516 = vst.msk [vmem:[%s2815_s20 + $0x70] sm:$0xff] %vm291_vm0, %v1500_v2  ;;  %v1501_v9 = vadd.f32 %v2805_v3, %v1481_v35 }
 0x4b8   : > { %1517 = vst.msk [vmem:[%s2815_s20 + $0x78] sm:$0xff] %vm291_vm0, %v1501_v9 }
 0x4b9   : > { %2006 = shalt.err (!%p2003_p2)
}
 0x4ba   : > { %s2007_s8 = scalar_lea.hbm %s2891_s17, 2048  ;;  %s2011_s19 = scalar_lea.hbm %s2948_s6, 4096 }
 0x4bb   : > { %p2008_p4 = scmp.ne.s32.totalorder %s2891_s17, %s2007_s8  ;;  %p2012_p9 = scmp.lt.u32.totalorder %s2891_s17, %s2948_s6 }
 0x4bc   : > { %p2013_p1 = scmp.lt.u32.totalorder %s2011_s19, %s2007_s8  ;;  %p2015_p6 = scmp.lt.u32.totalorder %s2007_s8, %s2891_s17 }
 0x4bd   : > { %p2009_p5 = pnand %p2008_p4, %p2955_p11 }
 0x4be   : > { %p2014_p3 = por %p2013_p1, %p2012_p9 }
 0x4bf   : > { %p2010_p7 = pneg %p2009_p5 }
 0x4c0   : > { %p2016_p12 = por %p2015_p6, %p2014_p3 }
 0x4c2   : > { %p2017_p13 = pnand %p2016_p12, %p2010_p7 }
 0x4c4   : > { %2020 = shalt.err (!%p2017_p13)
}
 0x4c5   : > { %s2068_s14 = smov 128   ;;  %s2069_s15 = smov 8  }
 0x4c6   : > { %1771 = dma.vmem_to_hbm [thread:$0]  (%p2955_p11), %s2893_s11, 2048, %s2891_s17, %s1519_s25, %s2068_s14, %s2068_s14, %s2069_s15  }
 0x4c7 PF: > { %s1548_s26 = sand.u32 1, %s2047_s21   ;;  %p2956_p8 = scmp.ne.s32.totalorder %s2953_s10, 0 }
 0x4c8   : > { %p2957_p10 = scmp.ge.s32.totalorder %s2059_s24, 2  ;;  %s1549_s28 = scalar_lea.sflag [#allocation4], %s1548_s26 }
 0x4ca   : > { %p1778_p0 = pnand %p2957_p10, %p2956_p8 }
 0x4cc   : > { %2042 = dma.done.wait (!%p1778_p0), %s1549_s28, 2048  }
 0x4cd   : > { %2044 = vsyncadd (!%p1778_p0), %s1549_s28, 4294965248  ;;  %p19_p2 = scmp.ge.s32.totalorder %s2130_s27, 4   ;;  %s2958_s21 = smov %s2051_s22 }
 0x4ce   : > { %s2959_s22 = smov %s2055_s23  ;;  %s2960_s23 = smov %s2142_s30 }
 0x4cf   : > { %s2961_s24 = smov %s2130_s27  ;;  %21 = sbr.rel (!%p19_p2) target bundleno = 5 (0x5), region = 89 }
 0x4d6   :  { %1554 = vsyncpa [#allocation3], 1 }
 0x4d7   :  { %1556 = vsyncpa [#allocation3 + $0x1], 1 }
 0x4d8   :  { %1557 = vsyncpa [#allocation4], 1 }
 0x4d9   :  { %1559 = vsyncpa [#allocation4 + $0x1], 1 }

</bundles_post_ra>
